<compile_context>
chip_gen: v7x
topology: tpu7x:2x2x1
jax: 0.10.0
libtpu: 0.0.40
codegen_flags: <defaults>
</compile_context>

<pallas_src>
import math
import functools

import jax
import jax.numpy as jnp
from jax.experimental import pallas as pl
from jax.experimental.pallas import tpu as pltpu


# ---------------- config (small shapes consistent with BATModelArgs) ----------
BSZ = 1
SEQ = 16
DIM = 32
N_HEADS = 4
HEAD_DIM = DIM // N_HEADS
EPS = 1e-5
SHAPE_INIT = 1.0          # args.shape_init
LOC_INIT = 0.0            # args.loc_init
START_POS = 0
NEG_BIG = -1e30           # finite "masked" value (avoids NaN on all-masked rows)


# ---------------- AttentionPrior slope setup (parameter glue, plain python) ---
def get_slopes(n):
    def get_slopes_power_of_2(n):
        start = 2 ** (-2 ** (-(math.log2(n) - 3)))
        ratio = start
        return [start * ratio ** i for i in range(n)]
    if math.log2(n).is_integer():
        return get_slopes_power_of_2(n)
    closest = 2 ** math.floor(math.log2(n))
    return (get_slopes_power_of_2(closest)
            + get_slopes(2 * closest)[0::2][: n - closest])


# ---------------- Pallas kernel: full attention in one invocation -------------
def bam_attn_kernel(x_ref, wq_ref, wk_ref, wv_ref, wo_ref,
                    scale_ref, shape_ref, loc_ref, o_ref,
                    *, n_heads, head_dim, seq):
    f32 = jnp.float32
    bf16 = jnp.bfloat16
    S = seq
    dim = n_heads * head_dim
    sm_scale = 1.0 / math.sqrt(head_dim)

    # matmul operands in bf16 (MXU-native on v6e/v7x), accumulate in f32
    x = x_ref[...].astype(bf16)                              # (S, D)

    # ---- position geometry shared by all heads (built in-kernel: no O(H*S^2)
    # ---- bias DMA from HBM; iota/abs/exp/log land on idle VPU/EUP slots) -----
    row = jax.lax.broadcasted_iota(jnp.int32, (S, S), 0)     # query index i
    col = jax.lax.broadcasted_iota(jnp.int32, (S, S), 1)     # key index j
    dist = (col - row).astype(f32)                           # k_pos - q_pos (start_pos=0)
    causal = col > row                                       # True -> masked

    # ---- AttentionPrior per-head parameters, vectorised transcendentals -----
    locs = loc_ref[...]                                      # (H, 1) f32
    scales = scale_ref[...]                                  # (H, 1) f32 (= log scale)
    shapes = shape_ref[...]                                  # (H, 1) f32
    loc_eff = jnp.exp(locs) - jnp.exp(-locs)                 # (H, 1)
    scale_eff = jnp.exp(scales)                              # (H, 1)

    # ---- per-head attention, statically unrolled (H = 4) ---------------------
    # Heads live on a leading axis of the weight refs -> no sub-(8,128) lane
    # slicing; per-head output projections are accumulated into one (S, D) f32
    # value, stored exactly once (v5e has a single vector-store slot).
    acc = jnp.zeros((S, dim), f32)
    for h in range(n_heads):
        wq_h = wq_ref[h].astype(bf16)                        # (D, hd)
        wk_h = wk_ref[h].astype(bf16)                        # (D, hd)
        wv_h = wv_ref[h].astype(bf16)                        # (D, hd)
        wo_h = wo_ref[h].astype(bf16)                        # (hd, D)

        qh = jnp.dot(x, wq_h, preferred_element_type=f32)    # (S, hd) f32
        kh = jnp.dot(x, wk_h, preferred_element_type=f32)    # (S, hd) f32
        vh = jnp.dot(x, wv_h, preferred_element_type=f32)    # (S, hd) f32

        # q @ k^T: contract last dims directly (no explicit transpose)
        sc = jax.lax.dot_general(
            qh.astype(bf16), kh.astype(bf16),
            dimension_numbers=(((1,), (1,)), ((), ())),
            preferred_element_type=f32) * sm_scale            # (S, S)

        # AttentionPrior:  -(|(dist - loc) * exp(scale)| + eps) ** shape
        z = (dist - loc_eff[h]) * scale_eff[h]
        prior = -jnp.exp(shapes[h] * jnp.log(jnp.abs(z) + EPS))
        sc = jnp.where(causal, NEG_BIG, sc + prior)

        # softmax over keys, exact divide (f32 elementwise math everywhere)
        m = jnp.max(sc, axis=-1, keepdims=True)
        e = jnp.exp(sc - m)
        p = e / jnp.sum(e, axis=-1, keepdims=True)

        oh = jnp.dot(p.astype(bf16), vh.astype(bf16),
                     preferred_element_type=f32)              # (S, hd)
        acc = acc + jnp.dot(oh.astype(bf16), wo_h,
                            preferred_element_type=f32)       # (S, D)

    o_ref[...] = acc                                          # single store


def bayesian_attention(x, wq, wk, wv, wo, scale_log, shape_p, loc_p):
    """x: (1, S, D); wq/wk/wv: (H*hd, D); wo: (D, H*hd); prior params: (H,1,1)."""
    _, S, D = x.shape
    H, hd = N_HEADS, HEAD_DIM

    x2d = x[0]
    # Per-head weight blocks on a leading axis (no in-kernel lane slicing).
    # y = x @ W.T  =>  per-head block wq3[h] has shape (D, hd).
    wq3 = wq.reshape(H, hd, D).transpose(0, 2, 1)            # (H, D, hd)
    wk3 = wk.reshape(H, hd, D).transpose(0, 2, 1)            # (H, D, hd)
    wv3 = wv.reshape(H, hd, D).transpose(0, 2, 1)            # (H, D, hd)
    wo3 = wo.T.reshape(H, hd, D)                             # (H, hd, D)

    scale2 = scale_log.reshape(H, 1).astype(jnp.float32)
    shape2 = shape_p.reshape(H, 1).astype(jnp.float32)
    loc2 = loc_p.reshape(H, 1).astype(jnp.float32)

    vmem = pl.BlockSpec(memory_space=pltpu.MemorySpace.VMEM)
    out = pl.pallas_call(
        functools.partial(bam_attn_kernel, n_heads=H, head_dim=hd, seq=S),
        out_shape=jax.ShapeDtypeStruct((S, D), jnp.float32),
        in_specs=[vmem] * 8,
        out_specs=vmem,
    )(x2d, wq3, wk3, wv3, wo3, scale2, shape2, loc2)
    return out[None]                                         # (1, S, D)


# ---------------- pure-JAX reference (same bf16-operand / f32-accum policy) ---
def reference(x, wq, wk, wv, wo, scale_log, shape_p, loc_p):
    b, S, D = x.shape
    H, hd = N_HEADS, HEAD_DIM
    bf16 = jnp.bfloat16
    f32 = jnp.float32

    xb = x.astype(bf16)
    q = jnp.einsum('bsd,ed->bse', xb, wq.astype(bf16), preferred_element_type=f32)
    k = jnp.einsum('bsd,ed->bse', xb, wk.astype(bf16), preferred_element_type=f32)
    v = jnp.einsum('bsd,ed->bse', xb, wv.astype(bf16), preferred_element_type=f32)
    q = q.reshape(b, S, H, hd).transpose(0, 2, 1, 3)
    k = k.reshape(b, S, H, hd).transpose(0, 2, 1, 3)
    v = v.reshape(b, S, H, hd).transpose(0, 2, 1, 3)

    scores = jnp.einsum('bhqe,bhke->bhqk', q.astype(bf16), k.astype(bf16),
                        preferred_element_type=f32) * (1.0 / math.sqrt(hd))

    # AttentionPrior (exact port of the module)
    q_pos = jnp.arange(S, dtype=f32) + START_POS
    k_pos = jnp.arange(S + START_POS, dtype=f32)
    dist = k_pos[None, :] - q_pos[:, None]                   # (S, S)
    loc = jnp.exp(loc_p) - jnp.exp(-loc_p)                   # (H,1,1)
    z = (dist[None] - loc) * jnp.exp(scale_log)              # (H,S,S)
    prior = -((jnp.abs(z) + EPS) ** shape_p)

    qi = jnp.arange(S)
    mask = jnp.where(qi[None, :] > qi[:, None], NEG_BIG, 0.0).astype(f32)
    scores = scores + prior[None] + mask[None, None]

    p = jax.nn.softmax(scores, axis=-1)
    outh = jnp.einsum('bhqk,bhke->bhqe', p.astype(bf16), v.astype(bf16),
                      preferred_element_type=f32)
    attn = outh.transpose(0, 2, 1, 3).reshape(b, S, H * hd)
    return jnp.einsum('bse,de->bsd', attn.astype(bf16), wo.astype(bf16),
                      preferred_element_type=f32)


if __name__ == "__main__":
    key = jax.random.PRNGKey(0)
    kx, kq, kk, kv, ko = jax.random.split(key, 5)

    # deterministic synthetic parameters (shapes per nn.Linear in __init__)
    std = 1.0 / math.sqrt(DIM)
    x = jax.random.normal(kx, (BSZ, SEQ, DIM), dtype=jnp.float32)
    wq = jax.random.normal(kq, (N_HEADS * HEAD_DIM, DIM), dtype=jnp.float32) * std
    wk = jax.random.normal(kk, (N_HEADS * HEAD_DIM, DIM), dtype=jnp.float32) * std
    wv = jax.random.normal(kv, (N_HEADS * HEAD_DIM, DIM), dtype=jnp.float32) * std
    wo = jax.random.normal(ko, (DIM, N_HEADS * HEAD_DIM), dtype=jnp.float32) * std

    # AttentionPrior parameters (deterministic, as in __init__, scale_init='slope')
    slopes = jnp.asarray(get_slopes(N_HEADS), dtype=jnp.float32)
    scale_log = jnp.log(slopes).reshape(N_HEADS, 1, 1)
    shape_p = jnp.full((N_HEADS, 1, 1), SHAPE_INIT, dtype=jnp.float32)
    loc_p = jnp.full((N_HEADS, 1, 1), LOC_INIT, dtype=jnp.float32)

    # TODO(synk): the module's stateful growable KV cache (and start_pos > 0
    # decoding) is host-side mutable state, not reproduced inside the kernel;
    # start_pos=0 prefill semantics are implemented exactly.

    out = bayesian_attention(x, wq, wk, wv, wo, scale_log, shape_p, loc_p)
    out = jax.block_until_ready(out)

    ref = reference(x, wq, wk, wv, wo, scale_log, shape_p, loc_p)
    assert out.shape == (BSZ, SEQ, DIM)
    # Kernel and reference share the same bf16-operand / f32-accumulate matmul
    # policy and an exact softmax divide, so agreement is tight; 5e-3 leaves
    # headroom for accumulation-order / transcendental-implementation deltas.
    assert jnp.allclose(out, ref, rtol=5e-3, atol=5e-3), "mismatch vs reference"
    print("KERNEL_OK")
</pallas_src>

<mosaic_0001>
module attributes {stable_mosaic.version = 11 : i64} {
  func.func @bam_attn_kernel(%arg0: memref<16x32xf32, #tpu.memory_space<vmem>>, %arg1: memref<4x32x8xf32, #tpu.memory_space<vmem>>, %arg2: memref<4x32x8xf32, #tpu.memory_space<vmem>>, %arg3: memref<4x32x8xf32, #tpu.memory_space<vmem>>, %arg4: memref<4x8x32xf32, #tpu.memory_space<vmem>>, %arg5: memref<4x1xf32, #tpu.memory_space<vmem>>, %arg6: memref<4x1xf32, #tpu.memory_space<vmem>>, %arg7: memref<4x1xf32, #tpu.memory_space<vmem>>, %arg8: memref<16x32xf32, #tpu.memory_space<vmem>>) attributes {dimension_semantics = [], scalar_prefetch = 0 : i64, scratch_operands = 0 : i64, tpu.core_type = #tpu.core_type<tc>} {
    %c0 = arith.constant 0 : index
    %c0_0 = arith.constant 0 : index
    %0 = vector.load %arg0[%c0, %c0_0] : memref<16x32xf32, #tpu.memory_space<vmem>>, vector<16x32xf32>
    %1 = arith.truncf %0 : vector<16x32xf32> to vector<16x32xbf16>
    %2 = tpu.iota {dimensions = array<i32: 0>} : vector<16x16xi32>
    %3 = tpu.iota {dimensions = array<i32: 1>} : vector<16x16xi32>
    %4 = arith.subi %3, %2 : vector<16x16xi32>
    %5 = arith.sitofp %4 : vector<16x16xi32> to vector<16x16xf32>
    %6 = arith.cmpi sgt, %3, %2 : vector<16x16xi32>
    %c0_1 = arith.constant 0 : index
    %c0_2 = arith.constant 0 : index
    %7 = vector.load %arg7[%c0_1, %c0_2] : memref<4x1xf32, #tpu.memory_space<vmem>>, vector<4x1xf32>
    %c0_3 = arith.constant 0 : index
    %c0_4 = arith.constant 0 : index
    %8 = vector.load %arg5[%c0_3, %c0_4] : memref<4x1xf32, #tpu.memory_space<vmem>>, vector<4x1xf32>
    %c0_5 = arith.constant 0 : index
    %c0_6 = arith.constant 0 : index
    %9 = vector.load %arg6[%c0_5, %c0_6] : memref<4x1xf32, #tpu.memory_space<vmem>>, vector<4x1xf32>
    %10 = math.exp %7 : vector<4x1xf32>
    %cst = arith.constant 0.000000e+00 : f32
    %11 = vector.broadcast %cst : f32 to vector<4x1xf32>
    %12 = arith.subf %11, %7 : vector<4x1xf32>
    %13 = math.exp %12 : vector<4x1xf32>
    %14 = arith.subf %10, %13 : vector<4x1xf32>
    %15 = math.exp %8 : vector<4x1xf32>
    %cst_7 = arith.constant 0.000000e+00 : f32
    %16 = vector.broadcast %cst_7 : f32 to vector<16x32xf32>
    %c0_8 = arith.constant 0 : index
    %c0_9 = arith.constant 0 : index
    %c0_10 = arith.constant 0 : index
    %17 = vector.load %arg1[%c0_8, %c0_9, %c0_10] : memref<4x32x8xf32, #tpu.memory_space<vmem>>, vector<1x32x8xf32>
    %18 = vector.shape_cast %17 : vector<1x32x8xf32> to vector<32x8xf32>
    %19 = arith.truncf %18 : vector<32x8xf32> to vector<32x8xbf16>
    %c0_11 = arith.constant 0 : index
    %c0_12 = arith.constant 0 : index
    %c0_13 = arith.constant 0 : index
    %20 = vector.load %arg2[%c0_11, %c0_12, %c0_13] : memref<4x32x8xf32, #tpu.memory_space<vmem>>, vector<1x32x8xf32>
    %21 = vector.shape_cast %20 : vector<1x32x8xf32> to vector<32x8xf32>
    %22 = arith.truncf %21 : vector<32x8xf32> to vector<32x8xbf16>
    %c0_14 = arith.constant 0 : index
    %c0_15 = arith.constant 0 : index
    %c0_16 = arith.constant 0 : index
    %23 = vector.load %arg3[%c0_14, %c0_15, %c0_16] : memref<4x32x8xf32, #tpu.memory_space<vmem>>, vector<1x32x8xf32>
    %24 = vector.shape_cast %23 : vector<1x32x8xf32> to vector<32x8xf32>
    %25 = arith.truncf %24 : vector<32x8xf32> to vector<32x8xbf16>
    %c0_17 = arith.constant 0 : index
    %c0_18 = arith.constant 0 : index
    %c0_19 = arith.constant 0 : index
    %26 = vector.load %arg4[%c0_17, %c0_18, %c0_19] : memref<4x8x32xf32, #tpu.memory_space<vmem>>, vector<1x8x32xf32>
    %27 = vector.shape_cast %26 : vector<1x8x32xf32> to vector<8x32xf32>
    %28 = arith.truncf %27 : vector<8x32xf32> to vector<8x32xbf16>
    %cst_20 = arith.constant dense<0.000000e+00> : vector<16x8xf32>
    %29 = tpu.matmul %1, %19, %cst_20 {dimension_numbers = #tpu.dot_dimension_numbers<[1], [0], [0], [1], [0, 0, 1, 1], [], []>} : vector<16x32xbf16>, vector<32x8xbf16>, vector<16x8xf32> -> vector<16x8xf32>
    %cst_21 = arith.constant dense<0.000000e+00> : vector<16x8xf32>
    %30 = tpu.matmul %1, %22, %cst_21 {dimension_numbers = #tpu.dot_dimension_numbers<[1], [0], [0], [1], [0, 0, 1, 1], [], []>} : vector<16x32xbf16>, vector<32x8xbf16>, vector<16x8xf32> -> vector<16x8xf32>
    %cst_22 = arith.constant dense<0.000000e+00> : vector<16x8xf32>
    %31 = tpu.matmul %1, %25, %cst_22 {dimension_numbers = #tpu.dot_dimension_numbers<[1], [0], [0], [1], [0, 0, 1, 1], [], []>} : vector<16x32xbf16>, vector<32x8xbf16>, vector<16x8xf32> -> vector<16x8xf32>
    %32 = arith.truncf %29 : vector<16x8xf32> to vector<16x8xbf16>
    %33 = arith.truncf %30 : vector<16x8xf32> to vector<16x8xbf16>
    %cst_23 = arith.constant dense<0.000000e+00> : vector<16x16xf32>
    %34 = tpu.matmul %32, %33, %cst_23 {dimension_numbers = #tpu.dot_dimension_numbers<[1], [1], [0], [0], [0, 0, 1, 0], [], []>} : vector<16x8xbf16>, vector<16x8xbf16>, vector<16x16xf32> -> vector<16x16xf32>
    %cst_24 = arith.constant 0.353553385 : f32
    %35 = vector.broadcast %cst_24 : f32 to vector<16x16xf32>
    %36 = arith.mulf %34, %35 : vector<16x16xf32>
    %37 = vector.extract_strided_slice %14 {offsets = [0, 0], sizes = [1, 1], strides = [1, 1]} : vector<4x1xf32> to vector<1x1xf32>
    %38 = vector.shape_cast %37 : vector<1x1xf32> to vector<1xf32>
    %39 = vector.shape_cast %38 : vector<1xf32> to vector<1x1xf32>
    %40 = vector.broadcast %39 : vector<1x1xf32> to vector<16x16xf32>
    %41 = arith.subf %5, %40 : vector<16x16xf32>
    %42 = vector.extract_strided_slice %15 {offsets = [0, 0], sizes = [1, 1], strides = [1, 1]} : vector<4x1xf32> to vector<1x1xf32>
    %43 = vector.shape_cast %42 : vector<1x1xf32> to vector<1xf32>
    %44 = vector.shape_cast %43 : vector<1xf32> to vector<1x1xf32>
    %45 = vector.broadcast %44 : vector<1x1xf32> to vector<16x16xf32>
    %46 = arith.mulf %41, %45 : vector<16x16xf32>
    %47 = vector.extract_strided_slice %9 {offsets = [0, 0], sizes = [1, 1], strides = [1, 1]} : vector<4x1xf32> to vector<1x1xf32>
    %48 = vector.shape_cast %47 : vector<1x1xf32> to vector<1xf32>
    %49 = math.absf %46 : vector<16x16xf32>
    %cst_25 = arith.constant 9.99999974E-6 : f32
    %50 = vector.broadcast %cst_25 : f32 to vector<16x16xf32>
    %51 = arith.addf %49, %50 : vector<16x16xf32>
    %52 = math.log %51 : vector<16x16xf32>
    %53 = vector.shape_cast %48 : vector<1xf32> to vector<1x1xf32>
    %54 = vector.broadcast %53 : vector<1x1xf32> to vector<16x16xf32>
    %55 = arith.mulf %54, %52 : vector<16x16xf32>
    %56 = math.exp %55 : vector<16x16xf32>
    %cst_26 = arith.constant 0.000000e+00 : f32
    %57 = vector.broadcast %cst_26 : f32 to vector<16x16xf32>
    %58 = arith.subf %57, %56 : vector<16x16xf32>
    %59 = arith.addf %36, %58 : vector<16x16xf32>
    %cst_27 = arith.constant -1.000000e+30 : f32
    %60 = vector.broadcast %cst_27 : f32 to vector<16x16xf32>
    %61 = arith.select %6, %60, %59 : vector<16x16xi1>, vector<16x16xf32>
    %cst_28 = arith.constant dense<0xFF800000> : vector<16xf32>
    %62 = vector.multi_reduction <maximumf>, %61, %cst_28 [1] : vector<16x16xf32> to vector<16xf32>
    %63 = vector.shape_cast %62 : vector<16xf32> to vector<16x1xf32>
    %64 = vector.broadcast %63 : vector<16x1xf32> to vector<16x16xf32>
    %65 = arith.subf %61, %64 : vector<16x16xf32>
    %66 = math.exp %65 : vector<16x16xf32>
    %cst_29 = arith.constant dense<0.000000e+00> : vector<16xf32>
    %67 = vector.multi_reduction <add>, %66, %cst_29 [1] : vector<16x16xf32> to vector<16xf32>
    %68 = vector.shape_cast %67 : vector<16xf32> to vector<16x1xf32>
    %69 = vector.broadcast %68 : vector<16x1xf32> to vector<16x16xf32>
    %70 = arith.divf %66, %69 : vector<16x16xf32>
    %71 = arith.truncf %70 : vector<16x16xf32> to vector<16x16xbf16>
    %72 = arith.truncf %31 : vector<16x8xf32> to vector<16x8xbf16>
    %cst_30 = arith.constant dense<0.000000e+00> : vector<16x8xf32>
    %73 = tpu.matmul %71, %72, %cst_30 {dimension_numbers = #tpu.dot_dimension_numbers<[1], [0], [0], [1], [0, 0, 1, 1], [], []>} : vector<16x16xbf16>, vector<16x8xbf16>, vector<16x8xf32> -> vector<16x8xf32>
    %74 = arith.truncf %73 : vector<16x8xf32> to vector<16x8xbf16>
    %cst_31 = arith.constant dense<0.000000e+00> : vector<16x32xf32>
    %75 = tpu.matmul %74, %28, %cst_31 {dimension_numbers = #tpu.dot_dimension_numbers<[1], [0], [0], [1], [0, 0, 1, 1], [], []>} : vector<16x8xbf16>, vector<8x32xbf16>, vector<16x32xf32> -> vector<16x32xf32>
    %76 = arith.addf %16, %75 : vector<16x32xf32>
    %c1 = arith.constant 1 : index
    %c0_32 = arith.constant 0 : index
    %c0_33 = arith.constant 0 : index
    %77 = vector.load %arg1[%c1, %c0_32, %c0_33] : memref<4x32x8xf32, #tpu.memory_space<vmem>>, vector<1x32x8xf32>
    %78 = vector.shape_cast %77 : vector<1x32x8xf32> to vector<32x8xf32>
    %79 = arith.truncf %78 : vector<32x8xf32> to vector<32x8xbf16>
    %c1_34 = arith.constant 1 : index
    %c0_35 = arith.constant 0 : index
    %c0_36 = arith.constant 0 : index
    %80 = vector.load %arg2[%c1_34, %c0_35, %c0_36] : memref<4x32x8xf32, #tpu.memory_space<vmem>>, vector<1x32x8xf32>
    %81 = vector.shape_cast %80 : vector<1x32x8xf32> to vector<32x8xf32>
    %82 = arith.truncf %81 : vector<32x8xf32> to vector<32x8xbf16>
    %c1_37 = arith.constant 1 : index
    %c0_38 = arith.constant 0 : index
    %c0_39 = arith.constant 0 : index
    %83 = vector.load %arg3[%c1_37, %c0_38, %c0_39] : memref<4x32x8xf32, #tpu.memory_space<vmem>>, vector<1x32x8xf32>
    %84 = vector.shape_cast %83 : vector<1x32x8xf32> to vector<32x8xf32>
    %85 = arith.truncf %84 : vector<32x8xf32> to vector<32x8xbf16>
    %c1_40 = arith.constant 1 : index
    %c0_41 = arith.constant 0 : index
    %c0_42 = arith.constant 0 : index
    %86 = vector.load %arg4[%c1_40, %c0_41, %c0_42] : memref<4x8x32xf32, #tpu.memory_space<vmem>>, vector<1x8x32xf32>
    %87 = vector.shape_cast %86 : vector<1x8x32xf32> to vector<8x32xf32>
    %88 = arith.truncf %87 : vector<8x32xf32> to vector<8x32xbf16>
    %cst_43 = arith.constant dense<0.000000e+00> : vector<16x8xf32>
    %89 = tpu.matmul %1, %79, %cst_43 {dimension_numbers = #tpu.dot_dimension_numbers<[1], [0], [0], [1], [0, 0, 1, 1], [], []>} : vector<16x32xbf16>, vector<32x8xbf16>, vector<16x8xf32> -> vector<16x8xf32>
    %cst_44 = arith.constant dense<0.000000e+00> : vector<16x8xf32>
    %90 = tpu.matmul %1, %82, %cst_44 {dimension_numbers = #tpu.dot_dimension_numbers<[1], [0], [0], [1], [0, 0, 1, 1], [], []>} : vector<16x32xbf16>, vector<32x8xbf16>, vector<16x8xf32> -> vector<16x8xf32>
    %cst_45 = arith.constant dense<0.000000e+00> : vector<16x8xf32>
    %91 = tpu.matmul %1, %85, %cst_45 {dimension_numbers = #tpu.dot_dimension_numbers<[1], [0], [0], [1], [0, 0, 1, 1], [], []>} : vector<16x32xbf16>, vector<32x8xbf16>, vector<16x8xf32> -> vector<16x8xf32>
    %92 = arith.truncf %89 : vector<16x8xf32> to vector<16x8xbf16>
    %93 = arith.truncf %90 : vector<16x8xf32> to vector<16x8xbf16>
    %cst_46 = arith.constant dense<0.000000e+00> : vector<16x16xf32>
    %94 = tpu.matmul %92, %93, %cst_46 {dimension_numbers = #tpu.dot_dimension_numbers<[1], [1], [0], [0], [0, 0, 1, 0], [], []>} : vector<16x8xbf16>, vector<16x8xbf16>, vector<16x16xf32> -> vector<16x16xf32>
    %cst_47 = arith.constant 0.353553385 : f32
    %95 = vector.broadcast %cst_47 : f32 to vector<16x16xf32>
    %96 = arith.mulf %94, %95 : vector<16x16xf32>
    %97 = vector.extract_strided_slice %14 {offsets = [1, 0], sizes = [1, 1], strides = [1, 1]} : vector<4x1xf32> to vector<1x1xf32>
    %98 = vector.shape_cast %97 : vector<1x1xf32> to vector<1xf32>
    %99 = vector.shape_cast %98 : vector<1xf32> to vector<1x1xf32>
    %100 = vector.broadcast %99 : vector<1x1xf32> to vector<16x16xf32>
    %101 = arith.subf %5, %100 : vector<16x16xf32>
    %102 = vector.extract_strided_slice %15 {offsets = [1, 0], sizes = [1, 1], strides = [1, 1]} : vector<4x1xf32> to vector<1x1xf32>
    %103 = vector.shape_cast %102 : vector<1x1xf32> to vector<1xf32>
    %104 = vector.shape_cast %103 : vector<1xf32> to vector<1x1xf32>
    %105 = vector.broadcast %104 : vector<1x1xf32> to vector<16x16xf32>
    %106 = arith.mulf %101, %105 : vector<16x16xf32>
    %107 = vector.extract_strided_slice %9 {offsets = [1, 0], sizes = [1, 1], strides = [1, 1]} : vector<4x1xf32> to vector<1x1xf32>
    %108 = vector.shape_cast %107 : vector<1x1xf32> to vector<1xf32>
    %109 = math.absf %106 : vector<16x16xf32>
    %cst_48 = arith.constant 9.99999974E-6 : f32
    %110 = vector.broadcast %cst_48 : f32 to vector<16x16xf32>
    %111 = arith.addf %109, %110 : vector<16x16xf32>
    %112 = math.log %111 : vector<16x16xf32>
    %113 = vector.shape_cast %108 : vector<1xf32> to vector<1x1xf32>
    %114 = vector.broadcast %113 : vector<1x1xf32> to vector<16x16xf32>
    %115 = arith.mulf %114, %112 : vector<16x16xf32>
    %116 = math.exp %115 : vector<16x16xf32>
    %cst_49 = arith.constant 0.000000e+00 : f32
    %117 = vector.broadcast %cst_49 : f32 to vector<16x16xf32>
    %118 = arith.subf %117, %116 : vector<16x16xf32>
    %119 = arith.addf %96, %118 : vector<16x16xf32>
    %cst_50 = arith.constant -1.000000e+30 : f32
    %120 = vector.broadcast %cst_50 : f32 to vector<16x16xf32>
    %121 = arith.select %6, %120, %119 : vector<16x16xi1>, vector<16x16xf32>
    %cst_51 = arith.constant dense<0xFF800000> : vector<16xf32>
    %122 = vector.multi_reduction <maximumf>, %121, %cst_51 [1] : vector<16x16xf32> to vector<16xf32>
    %123 = vector.shape_cast %122 : vector<16xf32> to vector<16x1xf32>
    %124 = vector.broadcast %123 : vector<16x1xf32> to vector<16x16xf32>
    %125 = arith.subf %121, %124 : vector<16x16xf32>
    %126 = math.exp %125 : vector<16x16xf32>
    %cst_52 = arith.constant dense<0.000000e+00> : vector<16xf32>
    %127 = vector.multi_reduction <add>, %126, %cst_52 [1] : vector<16x16xf32> to vector<16xf32>
    %128 = vector.shape_cast %127 : vector<16xf32> to vector<16x1xf32>
    %129 = vector.broadcast %128 : vector<16x1xf32> to vector<16x16xf32>
    %130 = arith.divf %126, %129 : vector<16x16xf32>
    %131 = arith.truncf %130 : vector<16x16xf32> to vector<16x16xbf16>
    %132 = arith.truncf %91 : vector<16x8xf32> to vector<16x8xbf16>
    %cst_53 = arith.constant dense<0.000000e+00> : vector<16x8xf32>
    %133 = tpu.matmul %131, %132, %cst_53 {dimension_numbers = #tpu.dot_dimension_numbers<[1], [0], [0], [1], [0, 0, 1, 1], [], []>} : vector<16x16xbf16>, vector<16x8xbf16>, vector<16x8xf32> -> vector<16x8xf32>
    %134 = arith.truncf %133 : vector<16x8xf32> to vector<16x8xbf16>
    %cst_54 = arith.constant dense<0.000000e+00> : vector<16x32xf32>
    %135 = tpu.matmul %134, %88, %cst_54 {dimension_numbers = #tpu.dot_dimension_numbers<[1], [0], [0], [1], [0, 0, 1, 1], [], []>} : vector<16x8xbf16>, vector<8x32xbf16>, vector<16x32xf32> -> vector<16x32xf32>
    %136 = arith.addf %76, %135 : vector<16x32xf32>
    %c2 = arith.constant 2 : index
    %c0_55 = arith.constant 0 : index
    %c0_56 = arith.constant 0 : index
    %137 = vector.load %arg1[%c2, %c0_55, %c0_56] : memref<4x32x8xf32, #tpu.memory_space<vmem>>, vector<1x32x8xf32>
    %138 = vector.shape_cast %137 : vector<1x32x8xf32> to vector<32x8xf32>
    %139 = arith.truncf %138 : vector<32x8xf32> to vector<32x8xbf16>
    %c2_57 = arith.constant 2 : index
    %c0_58 = arith.constant 0 : index
    %c0_59 = arith.constant 0 : index
    %140 = vector.load %arg2[%c2_57, %c0_58, %c0_59] : memref<4x32x8xf32, #tpu.memory_space<vmem>>, vector<1x32x8xf32>
    %141 = vector.shape_cast %140 : vector<1x32x8xf32> to vector<32x8xf32>
    %142 = arith.truncf %141 : vector<32x8xf32> to vector<32x8xbf16>
    %c2_60 = arith.constant 2 : index
    %c0_61 = arith.constant 0 : index
    %c0_62 = arith.constant 0 : index
    %143 = vector.load %arg3[%c2_60, %c0_61, %c0_62] : memref<4x32x8xf32, #tpu.memory_space<vmem>>, vector<1x32x8xf32>
    %144 = vector.shape_cast %143 : vector<1x32x8xf32> to vector<32x8xf32>
    %145 = arith.truncf %144 : vector<32x8xf32> to vector<32x8xbf16>
    %c2_63 = arith.constant 2 : index
    %c0_64 = arith.constant 0 : index
    %c0_65 = arith.constant 0 : index
    %146 = vector.load %arg4[%c2_63, %c0_64, %c0_65] : memref<4x8x32xf32, #tpu.memory_space<vmem>>, vector<1x8x32xf32>
    %147 = vector.shape_cast %146 : vector<1x8x32xf32> to vector<8x32xf32>
    %148 = arith.truncf %147 : vector<8x32xf32> to vector<8x32xbf16>
    %cst_66 = arith.constant dense<0.000000e+00> : vector<16x8xf32>
    %149 = tpu.matmul %1, %139, %cst_66 {dimension_numbers = #tpu.dot_dimension_numbers<[1], [0], [0], [1], [0, 0, 1, 1], [], []>} : vector<16x32xbf16>, vector<32x8xbf16>, vector<16x8xf32> -> vector<16x8xf32>
    %cst_67 = arith.constant dense<0.000000e+00> : vector<16x8xf32>
    %150 = tpu.matmul %1, %142, %cst_67 {dimension_numbers = #tpu.dot_dimension_numbers<[1], [0], [0], [1], [0, 0, 1, 1], [], []>} : vector<16x32xbf16>, vector<32x8xbf16>, vector<16x8xf32> -> vector<16x8xf32>
    %cst_68 = arith.constant dense<0.000000e+00> : vector<16x8xf32>
    %151 = tpu.matmul %1, %145, %cst_68 {dimension_numbers = #tpu.dot_dimension_numbers<[1], [0], [0], [1], [0, 0, 1, 1], [], []>} : vector<16x32xbf16>, vector<32x8xbf16>, vector<16x8xf32> -> vector<16x8xf32>
    %152 = arith.truncf %149 : vector<16x8xf32> to vector<16x8xbf16>
    %153 = arith.truncf %150 : vector<16x8xf32> to vector<16x8xbf16>
    %cst_69 = arith.constant dense<0.000000e+00> : vector<16x16xf32>
    %154 = tpu.matmul %152, %153, %cst_69 {dimension_numbers = #tpu.dot_dimension_numbers<[1], [1], [0], [0], [0, 0, 1, 0], [], []>} : vector<16x8xbf16>, vector<16x8xbf16>, vector<16x16xf32> -> vector<16x16xf32>
    %cst_70 = arith.constant 0.353553385 : f32
    %155 = vector.broadcast %cst_70 : f32 to vector<16x16xf32>
    %156 = arith.mulf %154, %155 : vector<16x16xf32>
    %157 = vector.extract_strided_slice %14 {offsets = [2, 0], sizes = [1, 1], strides = [1, 1]} : vector<4x1xf32> to vector<1x1xf32>
    %158 = vector.shape_cast %157 : vector<1x1xf32> to vector<1xf32>
    %159 = vector.shape_cast %158 : vector<1xf32> to vector<1x1xf32>
    %160 = vector.broadcast %159 : vector<1x1xf32> to vector<16x16xf32>
    %161 = arith.subf %5, %160 : vector<16x16xf32>
    %162 = vector.extract_strided_slice %15 {offsets = [2, 0], sizes = [1, 1], strides = [1, 1]} : vector<4x1xf32> to vector<1x1xf32>
    %163 = vector.shape_cast %162 : vector<1x1xf32> to vector<1xf32>
    %164 = vector.shape_cast %163 : vector<1xf32> to vector<1x1xf32>
    %165 = vector.broadcast %164 : vector<1x1xf32> to vector<16x16xf32>
    %166 = arith.mulf %161, %165 : vector<16x16xf32>
    %167 = vector.extract_strided_slice %9 {offsets = [2, 0], sizes = [1, 1], strides = [1, 1]} : vector<4x1xf32> to vector<1x1xf32>
    %168 = vector.shape_cast %167 : vector<1x1xf32> to vector<1xf32>
    %169 = math.absf %166 : vector<16x16xf32>
    %cst_71 = arith.constant 9.99999974E-6 : f32
    %170 = vector.broadcast %cst_71 : f32 to vector<16x16xf32>
    %171 = arith.addf %169, %170 : vector<16x16xf32>
    %172 = math.log %171 : vector<16x16xf32>
    %173 = vector.shape_cast %168 : vector<1xf32> to vector<1x1xf32>
    %174 = vector.broadcast %173 : vector<1x1xf32> to vector<16x16xf32>
    %175 = arith.mulf %174, %172 : vector<16x16xf32>
    %176 = math.exp %175 : vector<16x16xf32>
    %cst_72 = arith.constant 0.000000e+00 : f32
    %177 = vector.broadcast %cst_72 : f32 to vector<16x16xf32>
    %178 = arith.subf %177, %176 : vector<16x16xf32>
    %179 = arith.addf %156, %178 : vector<16x16xf32>
    %cst_73 = arith.constant -1.000000e+30 : f32
    %180 = vector.broadcast %cst_73 : f32 to vector<16x16xf32>
    %181 = arith.select %6, %180, %179 : vector<16x16xi1>, vector<16x16xf32>
    %cst_74 = arith.constant dense<0xFF800000> : vector<16xf32>
    %182 = vector.multi_reduction <maximumf>, %181, %cst_74 [1] : vector<16x16xf32> to vector<16xf32>
    %183 = vector.shape_cast %182 : vector<16xf32> to vector<16x1xf32>
    %184 = vector.broadcast %183 : vector<16x1xf32> to vector<16x16xf32>
    %185 = arith.subf %181, %184 : vector<16x16xf32>
    %186 = math.exp %185 : vector<16x16xf32>
    %cst_75 = arith.constant dense<0.000000e+00> : vector<16xf32>
    %187 = vector.multi_reduction <add>, %186, %cst_75 [1] : vector<16x16xf32> to vector<16xf32>
    %188 = vector.shape_cast %187 : vector<16xf32> to vector<16x1xf32>
    %189 = vector.broadcast %188 : vector<16x1xf32> to vector<16x16xf32>
    %190 = arith.divf %186, %189 : vector<16x16xf32>
    %191 = arith.truncf %190 : vector<16x16xf32> to vector<16x16xbf16>
    %192 = arith.truncf %151 : vector<16x8xf32> to vector<16x8xbf16>
    %cst_76 = arith.constant dense<0.000000e+00> : vector<16x8xf32>
    %193 = tpu.matmul %191, %192, %cst_76 {dimension_numbers = #tpu.dot_dimension_numbers<[1], [0], [0], [1], [0, 0, 1, 1], [], []>} : vector<16x16xbf16>, vector<16x8xbf16>, vector<16x8xf32> -> vector<16x8xf32>
    %194 = arith.truncf %193 : vector<16x8xf32> to vector<16x8xbf16>
    %cst_77 = arith.constant dense<0.000000e+00> : vector<16x32xf32>
    %195 = tpu.matmul %194, %148, %cst_77 {dimension_numbers = #tpu.dot_dimension_numbers<[1], [0], [0], [1], [0, 0, 1, 1], [], []>} : vector<16x8xbf16>, vector<8x32xbf16>, vector<16x32xf32> -> vector<16x32xf32>
    %196 = arith.addf %136, %195 : vector<16x32xf32>
    %c3 = arith.constant 3 : index
    %c0_78 = arith.constant 0 : index
    %c0_79 = arith.constant 0 : index
    %197 = vector.load %arg1[%c3, %c0_78, %c0_79] : memref<4x32x8xf32, #tpu.memory_space<vmem>>, vector<1x32x8xf32>
    %198 = vector.shape_cast %197 : vector<1x32x8xf32> to vector<32x8xf32>
    %199 = arith.truncf %198 : vector<32x8xf32> to vector<32x8xbf16>
    %c3_80 = arith.constant 3 : index
    %c0_81 = arith.constant 0 : index
    %c0_82 = arith.constant 0 : index
    %200 = vector.load %arg2[%c3_80, %c0_81, %c0_82] : memref<4x32x8xf32, #tpu.memory_space<vmem>>, vector<1x32x8xf32>
    %201 = vector.shape_cast %200 : vector<1x32x8xf32> to vector<32x8xf32>
    %202 = arith.truncf %201 : vector<32x8xf32> to vector<32x8xbf16>
    %c3_83 = arith.constant 3 : index
    %c0_84 = arith.constant 0 : index
    %c0_85 = arith.constant 0 : index
    %203 = vector.load %arg3[%c3_83, %c0_84, %c0_85] : memref<4x32x8xf32, #tpu.memory_space<vmem>>, vector<1x32x8xf32>
    %204 = vector.shape_cast %203 : vector<1x32x8xf32> to vector<32x8xf32>
    %205 = arith.truncf %204 : vector<32x8xf32> to vector<32x8xbf16>
    %c3_86 = arith.constant 3 : index
    %c0_87 = arith.constant 0 : index
    %c0_88 = arith.constant 0 : index
    %206 = vector.load %arg4[%c3_86, %c0_87, %c0_88] : memref<4x8x32xf32, #tpu.memory_space<vmem>>, vector<1x8x32xf32>
    %207 = vector.shape_cast %206 : vector<1x8x32xf32> to vector<8x32xf32>
    %208 = arith.truncf %207 : vector<8x32xf32> to vector<8x32xbf16>
    %cst_89 = arith.constant dense<0.000000e+00> : vector<16x8xf32>
    %209 = tpu.matmul %1, %199, %cst_89 {dimension_numbers = #tpu.dot_dimension_numbers<[1], [0], [0], [1], [0, 0, 1, 1], [], []>} : vector<16x32xbf16>, vector<32x8xbf16>, vector<16x8xf32> -> vector<16x8xf32>
    %cst_90 = arith.constant dense<0.000000e+00> : vector<16x8xf32>
    %210 = tpu.matmul %1, %202, %cst_90 {dimension_numbers = #tpu.dot_dimension_numbers<[1], [0], [0], [1], [0, 0, 1, 1], [], []>} : vector<16x32xbf16>, vector<32x8xbf16>, vector<16x8xf32> -> vector<16x8xf32>
    %cst_91 = arith.constant dense<0.000000e+00> : vector<16x8xf32>
    %211 = tpu.matmul %1, %205, %cst_91 {dimension_numbers = #tpu.dot_dimension_numbers<[1], [0], [0], [1], [0, 0, 1, 1], [], []>} : vector<16x32xbf16>, vector<32x8xbf16>, vector<16x8xf32> -> vector<16x8xf32>
    %212 = arith.truncf %209 : vector<16x8xf32> to vector<16x8xbf16>
    %213 = arith.truncf %210 : vector<16x8xf32> to vector<16x8xbf16>
    %cst_92 = arith.constant dense<0.000000e+00> : vector<16x16xf32>
    %214 = tpu.matmul %212, %213, %cst_92 {dimension_numbers = #tpu.dot_dimension_numbers<[1], [1], [0], [0], [0, 0, 1, 0], [], []>} : vector<16x8xbf16>, vector<16x8xbf16>, vector<16x16xf32> -> vector<16x16xf32>
    %cst_93 = arith.constant 0.353553385 : f32
    %215 = vector.broadcast %cst_93 : f32 to vector<16x16xf32>
    %216 = arith.mulf %214, %215 : vector<16x16xf32>
    %217 = vector.extract_strided_slice %14 {offsets = [3, 0], sizes = [1, 1], strides = [1, 1]} : vector<4x1xf32> to vector<1x1xf32>
    %218 = vector.shape_cast %217 : vector<1x1xf32> to vector<1xf32>
    %219 = vector.shape_cast %218 : vector<1xf32> to vector<1x1xf32>
    %220 = vector.broadcast %219 : vector<1x1xf32> to vector<16x16xf32>
    %221 = arith.subf %5, %220 : vector<16x16xf32>
    %222 = vector.extract_strided_slice %15 {offsets = [3, 0], sizes = [1, 1], strides = [1, 1]} : vector<4x1xf32> to vector<1x1xf32>
    %223 = vector.shape_cast %222 : vector<1x1xf32> to vector<1xf32>
    %224 = vector.shape_cast %223 : vector<1xf32> to vector<1x1xf32>
    %225 = vector.broadcast %224 : vector<1x1xf32> to vector<16x16xf32>
    %226 = arith.mulf %221, %225 : vector<16x16xf32>
    %227 = vector.extract_strided_slice %9 {offsets = [3, 0], sizes = [1, 1], strides = [1, 1]} : vector<4x1xf32> to vector<1x1xf32>
    %228 = vector.shape_cast %227 : vector<1x1xf32> to vector<1xf32>
    %229 = math.absf %226 : vector<16x16xf32>
    %cst_94 = arith.constant 9.99999974E-6 : f32
    %230 = vector.broadcast %cst_94 : f32 to vector<16x16xf32>
    %231 = arith.addf %229, %230 : vector<16x16xf32>
    %232 = math.log %231 : vector<16x16xf32>
    %233 = vector.shape_cast %228 : vector<1xf32> to vector<1x1xf32>
    %234 = vector.broadcast %233 : vector<1x1xf32> to vector<16x16xf32>
    %235 = arith.mulf %234, %232 : vector<16x16xf32>
    %236 = math.exp %235 : vector<16x16xf32>
    %cst_95 = arith.constant 0.000000e+00 : f32
    %237 = vector.broadcast %cst_95 : f32 to vector<16x16xf32>
    %238 = arith.subf %237, %236 : vector<16x16xf32>
    %239 = arith.addf %216, %238 : vector<16x16xf32>
    %cst_96 = arith.constant -1.000000e+30 : f32
    %240 = vector.broadcast %cst_96 : f32 to vector<16x16xf32>
    %241 = arith.select %6, %240, %239 : vector<16x16xi1>, vector<16x16xf32>
    %cst_97 = arith.constant dense<0xFF800000> : vector<16xf32>
    %242 = vector.multi_reduction <maximumf>, %241, %cst_97 [1] : vector<16x16xf32> to vector<16xf32>
    %243 = vector.shape_cast %242 : vector<16xf32> to vector<16x1xf32>
    %244 = vector.broadcast %243 : vector<16x1xf32> to vector<16x16xf32>
    %245 = arith.subf %241, %244 : vector<16x16xf32>
    %246 = math.exp %245 : vector<16x16xf32>
    %cst_98 = arith.constant dense<0.000000e+00> : vector<16xf32>
    %247 = vector.multi_reduction <add>, %246, %cst_98 [1] : vector<16x16xf32> to vector<16xf32>
    %248 = vector.shape_cast %247 : vector<16xf32> to vector<16x1xf32>
    %249 = vector.broadcast %248 : vector<16x1xf32> to vector<16x16xf32>
    %250 = arith.divf %246, %249 : vector<16x16xf32>
    %251 = arith.truncf %250 : vector<16x16xf32> to vector<16x16xbf16>
    %252 = arith.truncf %211 : vector<16x8xf32> to vector<16x8xbf16>
    %cst_99 = arith.constant dense<0.000000e+00> : vector<16x8xf32>
    %253 = tpu.matmul %251, %252, %cst_99 {dimension_numbers = #tpu.dot_dimension_numbers<[1], [0], [0], [1], [0, 0, 1, 1], [], []>} : vector<16x16xbf16>, vector<16x8xbf16>, vector<16x8xf32> -> vector<16x8xf32>
    %254 = arith.truncf %253 : vector<16x8xf32> to vector<16x8xbf16>
    %cst_100 = arith.constant dense<0.000000e+00> : vector<16x32xf32>
    %255 = tpu.matmul %254, %208, %cst_100 {dimension_numbers = #tpu.dot_dimension_numbers<[1], [0], [0], [1], [0, 0, 1, 1], [], []>} : vector<16x8xbf16>, vector<8x32xbf16>, vector<16x32xf32> -> vector<16x32xf32>
    %256 = arith.addf %196, %255 : vector<16x32xf32>
    %c0_101 = arith.constant 0 : index
    %c0_102 = arith.constant 0 : index
    %257 = vector.load %arg8[%c0_101, %c0_102] : memref<16x32xf32, #tpu.memory_space<vmem>>, vector<16x32xf32>
    tpu.vector_store %arg8[%c0_101, %c0_102], %256 {strides = array<i32>} : memref<16x32xf32, #tpu.memory_space<vmem>>, vector<16x32xf32>,
    return
  }
}

</mosaic_0001>

<bundles_post_ra>
// kernel: tpu_custom_call.1
= control target key start
LH: loop header
LB: loop body
LE: loop exit
PB: predicated region body
PF: predicated region fallthrough
CT: control target
= control target key end

     0   :  { %v1907_v3 = vmov 0.0   ;;  %vm1908_vm0 = vmmov 0   ;;  %s2370_s0 = inlined_call_operand.vmem [shape: f32[16,32], index: 0, kind: input, shape index: {}]   ;;  %s2371_s1 = inlined_call_operand.vmem [shape: f32[4,32,8], index: 1, kind: input, shape index: {}]   ;;  %s2372_s2 = inlined_call_operand.vmem [shape: f32[4,32,8], index: 2, kind: input, shape index: {}]   ;;  %s2373_s3 = inlined_call_operand.vmem [shape: f32[4,32,8], index: 3, kind: input, shape index: {}]   ;;  %s2374_s4 = inlined_call_operand.vmem [shape: f32[4,8,32], index: 4, kind: input, shape index: {}]   ;;  %s2375_s5 = inlined_call_operand.vmem [shape: f32[4,1], index: 5, kind: input, shape index: {}]   ;;  %s2376_s6 = inlined_call_operand.vmem [shape: f32[4,1], index: 6, kind: input, shape index: {}]   ;;  %s2377_s7 = inlined_call_operand.vmem [shape: f32[4,1], index: 7, kind: input, shape index: {}]   ;;  %s2378_s8 = inlined_call_operand.hbm [shape: f32[16,32], index: 8, kind: output, shape index: {}]  }
   0x1   :  { %v56_v0 = vld [vmem:[%s2371_s1] sm:$0xff]  ;;  %v57_v1 = vld [vmem:[%s2371_s1 + $0x8] sm:$0xff]  ;;  %v58_v2 = vld [vmem:[%s2371_s1 + $0x10] sm:$0xff]  ;;  %1604 = vmatprep.subr.bf16.mxu1 %v1907_v3  ;;  %1608 = vmatprep.mubr.msk.bf16.mxu1 %vm1908_vm0, %v1907_v3 }
   0x2   :  { %v60_v4 = vpack.c.bf16 %v57_v1, %v56_v0  ;;  %v59_v5 = vld [vmem:[%s2371_s1 + $0x18] sm:$0xff]  ;;  %1620 = vmatprep.subr.bf16.mxu0 %v1907_v3  ;;  %1624 = vmatprep.mubr.msk.bf16.mxu0 %vm1908_vm0, %v1907_v3  ;;  %v31_v7 = vld [vmem:[%s2370_s0] sm:$0xff]  ;;  %v32_v8 = vld [vmem:[%s2370_s0 + $0x8] sm:$0xff] }
   0x3   :  { %v61_v6 = vpack.c.bf16 %v59_v5, %v58_v2 }
   0x4   :  { %1605 = vmatpush3.bf16.msra.mxu1 %v60_v4 }
   0x5   :  { %13 = vsyncpa [#allocation3], 0  ;;  %1606 = vmatprep.subr.bf16.mxu1 %v1907_v3  ;;  %v62_v9 = vld [vmem:[%s2372_s2] sm:$0xff]  ;;  %v63_v10 = vld [vmem:[%s2372_s2 + $0x8] sm:$0xff]  ;;  %v1988_v11 = vpack.c.bf16 %v32_v8, %v31_v7  ;;  %vm76_vm1 = vcmask 261120   ;;  %vm205_vm2 = vcmask 64512   ;;  %v34_v44 = vlaneseq }
   0x6   :  { %v66_v12 = vpack.c.bf16 %v63_v10, %v62_v9  ;;  %v64_v13 = vld [vmem:[%s2372_s2 + $0x10] sm:$0xff]  ;;  %v65_v14 = vld [vmem:[%s2372_s2 + $0x18] sm:$0xff]  ;;  %v45_v16 = vld [vmem:[%s2377_s7] sm:$0xf]  ;;  %vm291_vm4 = vcmask 130048   ;;  %vm667_vm6 = vcmask 1043456  }
   0x7   :  { %v67_v15 = vpack.c.bf16 %v65_v14, %v64_v13  ;;  %v46_v17 = vld [vmem:[%s2375_s5] sm:$0xf]  ;;  %v48_v18 = vmul.f32 1.442695, %v45_v16  ;;  %v50_v19 = vsub.f32 0.0, %v45_v16  ;;  %v69_v39 = vld [vmem:[%s2373_s3 + $0x8] sm:$0xff] }
   0x8   :  { %1607 = vmatpush3.bf16.msra.mxu1 %v61_v6  ;;  %v54_v20 = vmul.f32 1.442695, %v46_v17  ;;  %v2020_v26 = vld [vmem:[%s2376_s6] sm:$0xf]  ;;  %v70_v40 = vld [vmem:[%s2373_s3 + $0x10] sm:$0xff]  ;;  %v71_v42 = vld [vmem:[%s2373_s3 + $0x18] sm:$0xff] }
   0x9   :  { %1612 = vmatprep.subr.bf16.mxu1 %v1907_v3  ;;  %1813 = vpow2.f32 %v48_v18  ;;  %v51_v21 = vmul.f32 1.442695, %v50_v19  ;;  %v68_v38 = vld [vmem:[%s2373_s3] sm:$0xff]  ;;  %v73_v43 = vpack.c.bf16 %v71_v42, %v70_v40  ;;  %v2048_v45 = vshrl.u32 %v34_v44, 7  ;;  %s1909_s22 = smov [#allocation2]  }
   0xa   :  { %v72_v41 = vpack.c.bf16 %v69_v39, %v68_v38  ;;  %v2050_v46 = vand.u32 127, %v34_v44  ;;  %v1487_v44 = vld [vmem:[%s2371_s1 + $0x28] sm:$0xff]  ;;  %s1470_s23 = sshll.u32 %s1909_s22, 4  ;;  %s1471_s23 = int_to_ptr.vmem [resolvable:$true] %s1470_s23 }
   0xb   :  { %1609 = vmatmul.mubr.msk.bf16.vlgmr.msra.gmra.mrb[0].mxu1 %vm76_vm1, %v1988_v11  ;;  %1815 = vpow2.f32 %v51_v21  ;;  %v2053_v47 = vadd.s32 8, %v2048_v45  ;;  %p1888_p1 = scmp.lt.s32.totalorder %s1471_s23, %s1471_s23 }
   0xc   :  { %1613 = vmatpush3.bf16.msra.mxu1 %v66_v12  ;;  %1616 = vmatprep.mubr.msk.bf16.mxu1 %vm1908_vm0, %v1907_v3  ;;  %1817 = vpow2.f32 %v54_v20  ;;  %v39_v48 = vsub.s32 %v2050_v46, %v2048_v45  ;;  %vm43_vm3 = vcmp.gt.s32.totalorder %v2050_v46, %v2048_v45 }
   0xd   :  { %1614 = vmatprep.subr.bf16.mxu1 %v1907_v3  ;;  %1621 = vmatpush3.bf16.msra.mxu0 %v72_v41  ;;  %v40_v49 = vsub.s32 %v2050_v46, %v2053_v47  ;;  %vm44_vm5 = vcmp.gt.s32.totalorder %v2050_v46, %v2053_v47 }
   0xe   :  { %1622 = vmatprep.subr.bf16.mxu0 %v1907_v3  ;;  %v2059_v50 = vcvt.s32.f32 %v39_v48 }
   0xf   :  { %v2061_v52 = vcvt.s32.f32 %v40_v49  ;;  %v1488_v49 = vld [vmem:[%s2371_s1 + $0x30] sm:$0xff] }
  0x10   :  { %1615 = vmatpush3.bf16.msra.mxu1 %v67_v15 }
  0x11   :  { %1628 = vmatprep.subr.bf16.mxu1 %v1907_v3  ;;  %1623 = vmatpush3.bf16.msra.mxu0 %v73_v43  ;;  %v1486_v43 = vld [vmem:[%s2371_s1 + $0x20] sm:$0xff] }
  0x12   :  { %1634 = vmatprep.subr.bf16.mxu0 %v1907_v3  ;;  %v366_v48 = vpack.c.bf16 %v1487_v44, %v1486_v43 }
  0x13   :  { %1617 = vmatmul.mubr.msk.bf16.vlgmr.msra.gmra.mrb[4].mxu1 %vm76_vm1, %v1988_v11  ;;  %v1814_v22 = vpop.eup %1813 }
  0x14   :  { %1630 = vmatprep.mubr.msk.bf16.mxu1 %vm1908_vm0, %v1907_v3  ;;  %1625 = vmatmul.mubr.msk.bf16.vlgmr.msra.gmra.mrb[0].mxu0 %vm76_vm1, %v1988_v11 }
  0x15   :  { %v1816_v23 = vpop.eup %1815  ;;  %1636 = vmatprep.mubr.msk.bf16.mxu0 %vm1908_vm0, %v1907_v3 }
  0x16   :  { %v2013_v24 = vpop.eup %1817  ;;  %v2015_v25 = vsub.f32 %v1814_v22, %v1816_v23 }
  0x18   :  { %1784 = vpush %v2015_v25 }
  0x19   :  { %1786 = vpush %v2013_v24 }
  0x1a   :  { %1788 = vpush %v2020_v26 }
  0x49   :  { %s1785_s13 = spop %1784 }
  0x4a   :  { %v257_v51 = vstv %s1785_s13  ;;  %s1787_s14 = spop %1786 }
  0x4b   :  { %v259_v53 = vsub.f32 %v2059_v50, %v257_v51  ;;  %v263_v54 = vstv %s1787_s14  ;;  %v260_v55 = vsub.f32 %v2061_v52, %v257_v51  ;;  %s1789_s15 = spop %1788  ;;  %v1489_v51 = vld [vmem:[%s2371_s1 + $0x38] sm:$0xff] }
  0x4c   :  { %v277_v1 = vstv %s1789_s15 }
  0x4d   :  { %v265_v56 = vmul.f32 %v263_v54, %v259_v53  ;;  %v266_v57 = vmul.f32 %v263_v54, %v260_v55  ;;  %v367_v53 = vpack.c.bf16 %v1489_v51, %v1488_v49 }
  0x4f   :  { %v267_v58 = vand.u32 2147483647, %v265_v56  ;;  %v268_v59 = vand.u32 2147483647, %v266_v57  ;;  %v1490_v57 = vld [vmem:[%s2372_s2 + $0x20] sm:$0xff] }
  0x51   :  { %v269_v60 = vadd.f32 1e-05, %v267_v58  ;;  %v270_v61 = vadd.f32 1e-05, %v268_v59  ;;  %v1491_v58 = vld [vmem:[%s2372_s2 + $0x28] sm:$0xff] }
  0x53   :  { %1819 = vlog2.f32 %v269_v60 }
  0x54   :  { %1821 = vlog2.f32 %v270_v61 }
  0x5d   :  { %v1820_v62 = vpop.eup %1819 }
  0x5e   :  { %v272_v63 = vmul.f32 0.6931472, %v1820_v62  ;;  %v1822_v0 = vpop.eup %1821  ;;  %v373_v62 = vpack.c.bf16 %v1491_v58, %v1490_v57 }
  0x5f   :  { %v274_v2 = vmul.f32 0.6931472, %v1822_v0  ;;  %v1492_v0 = vld [vmem:[%s2372_s2 + $0x30] sm:$0xff] }
  0x60   :  { %v279_v4 = vmul.f32 %v277_v1, %v272_v63 }
  0x61   :  { %v280_v5 = vmul.f32 %v277_v1, %v274_v2  ;;  %v1493_v1 = vld [vmem:[%s2372_s2 + $0x38] sm:$0xff] }
  0x62   :  { %v281_v6 = vmul.f32 1.442695, %v279_v4  ;;  %v374_v2 = vpack.c.bf16 %v1493_v1, %v1492_v0 }
  0x63   :  { %v283_v7 = vmul.f32 1.442695, %v280_v5 }
  0x64   :  { %1823 = vpow2.f32 %v281_v6 }
  0x65   :  { %1825 = vpow2.f32 %v283_v7 }
  0x6e   :  { %v1824_v8 = vpop.eup %1823 }
  0x6f   :  { %v285_v9 = vsub.f32 0.0, %v1824_v8  ;;  %v1826_v10 = vpop.eup %1825 }
  0x70   :  { %v286_v18 = vsub.f32 0.0, %v1826_v10  ;;  %v565_v10 = vrot.slane %v2013_v24, 1 }
  0xde   :  { %v114_v27 = vpop.f32.mrb[0].mxu1 }
  0xdf   :  { %v1610_v28 = vpop.f32.mrb[1].mxu1 }
  0xe0   :  { %v117_v29 = vpop.f32.mrb[2].mxu1 }
  0xe1   :  { %v203_v30 = vpack.c.bf16 %v117_v29, %v114_v27  ;;  %v1611_v31 = vpop.f32.mrb[3].mxu1 }
  0xe6   :  { %v155_v32 = vpop.f32.mrb[4].mxu1 }
  0xe7   :  { %v1618_v33 = vpop.f32.mrb[5].mxu1  ;;  %v196_v38 = vpop.f32.mrb[0].mxu0 }
  0xe8   :  { %v158_v34 = vpop.f32.mrb[6].mxu1  ;;  %v1626_v39 = vpop.f32.mrb[1].mxu0 }
  0xe9   :  { %v204_v35 = vpack.c.bf16 %v158_v34, %v155_v32  ;;  %v1619_v36 = vpop.f32.mrb[7].mxu1  ;;  %v199_v40 = vpop.f32.mrb[2].mxu0 }
  0xea   :  { %v1627_v41 = vpop.f32.mrb[3].mxu0  ;;  %v315_v42 = vpack.c.bf16 %v199_v40, %v196_v38 }
  0xeb   :  { %v210_v37 = vsel %vm205_vm2, %v204_v35, 0 }
  0xec   :  { %1629 = vmatpush3.bf16.xpose.msra.mxu1 %v210_v37  ;;  %1635 = vmatpush3.bf16.msra.mxu0 %v315_v42 }
  0xed   :  { %1640 = vmatprep.subr.bf16.mxu1 %v1907_v3  ;;  %1648 = vmatprep.subr.bf16.mxu0 %v1907_v3 }
  0xf3   :  { %1631 = vmatmul.mubr.msk.bf16.vlgmr.msra.gmra.mrb[8].mxu1 %vm205_vm2, %v203_v30 }
  0xf4   :  { %1644 = vmatprep.mubr.msk.bf16.mxu1 %vm1908_vm0, %v1907_v3  ;;  %1641 = vmatpush3.bf16.msra.mxu1 %v366_v48 }
  0xf5   :  { %1642 = vmatprep.subr.bf16.mxu1 %v1907_v3 }
  0xf8   :  { %1643 = vmatpush3.bf16.msra.mxu1 %v367_v53 }
  0xf9   :  { %1656 = vmatprep.subr.bf16.mxu1 %v1907_v3 }
  0xfb   :  { %1645 = vmatmul.mubr.msk.bf16.vlgmr.msra.gmra.mrb[12].mxu1 %vm76_vm1, %v1988_v11 }
  0xfc   :  { %1660 = vmatprep.mubr.msk.bf16.mxu1 %vm1908_vm0, %v1907_v3 }
 0x1c6   :  { %v246_v12 = vpop.f32.mrb[8].mxu1 }
 0x1c7   :  { %v253_v13 = vmul.f32 0.35355338, %v246_v12  ;;  %v1632_v14 = vpop.f32.mrb[9].mxu1  ;;  %v579_v12 = vrot.slane %v2020_v26, 1 }
 0x1c8   :  { %v249_v15 = vpop.f32.mrb[10].mxu1 }
 0x1c9   :  { %v287_v16 = vadd.f32 %v285_v9, %v253_v13  ;;  %v254_v17 = vmul.f32 0.35355338, %v249_v15  ;;  %v1633_v19 = vpop.f32.mrb[11].mxu1  ;;  %v559_v9 = vrot.slane %v2015_v25, 1 }
 0x1cb   :  { %v288_v20 = vadd.f32 %v286_v18, %v254_v17  ;;  %v289_v21 = vsel %vm43_vm3, -1e+30, %v287_v16  ;;  %1790 = vpush %v559_v9 }
 0x1cc   :  { %v292_v22 = vsel %vm291_vm4, %v289_v21, -inf  ;;  %1792 = vpush %v565_v10 }
 0x1cd   :  { %293 = vmax.xlane.f32.xlu0 %v292_v22  ;;  %v290_v23 = vsel %vm44_vm5, -1e+30, %v288_v20  ;;  %1794 = vpush %v579_v12 }
 0x1ce   :  { %v295_v27 = vsel %vm291_vm4, %v290_v23, -inf  ;;  %v419_v4 = vpop.f32.mrb[12].mxu1 }
 0x1cf   :  { %v1646_v5 = vpop.f32.mrb[13].mxu1 }
 0x1d0   :  { %v422_v6 = vpop.f32.mrb[14].mxu1 }
 0x1d1   :  { %296 = vmax.xlane.f32.xlu0 %v295_v27  ;;  %v508_v7 = vpack.c.bf16 %v422_v6, %v419_v4  ;;  %v1647_v8 = vpop.f32.mrb[15].mxu1  ;;  %v1494_v27 = vld [vmem:[%s2373_s3 + $0x20] sm:$0xff] }
 0x1fc   :  { %s1791_s14 = spop %1790 }
 0x1fd   :  { %s1793_s15 = spop %1792 }
 0x1fe   :  { %s1795_s16 = spop %1794 }
 0x1ff   :  { %v581_v49 = vstv %s1795_s16 }
 0x25a   :  { %v294_v28 = vpop.xlane.xlu0 %293 }
 0x25b   :  { %v298_v29 = vsub.f32 %v289_v21, %v294_v28  ;;  %v1495_v28 = vld [vmem:[%s2373_s3 + $0x28] sm:$0xff] }
 0x25d   :  { %v300_v30 = vmul.f32 1.442695, %v298_v29  ;;  %v1496_v29 = vld [vmem:[%s2373_s3 + $0x30] sm:$0xff] }
 0x25e   :  { %v297_v31 = vpop.xlane.xlu0 %296 }
 0x25f   :  { %1827 = vpow2.f32 %v300_v30  ;;  %v299_v32 = vsub.f32 %v290_v23, %v297_v31  ;;  %v380_v30 = vpack.c.bf16 %v1495_v28, %v1494_v27  ;;  %v1497_v31 = vld [vmem:[%s2373_s3 + $0x38] sm:$0xff] }
 0x261   :  { %v302_v33 = vmul.f32 1.442695, %v299_v32  ;;  %1657 = vmatpush3.bf16.msra.mxu1 %v380_v30  ;;  %v381_v32 = vpack.c.bf16 %v1497_v31, %v1496_v29 }
 0x262   :  { %1658 = vmatprep.subr.bf16.mxu1 %v1907_v3 }
 0x263   :  { %1829 = vpow2.f32 %v302_v33  ;;  %v561_v33 = vstv %s1791_s14 }
 0x265   :  { %1659 = vmatpush3.bf16.msra.mxu1 %v381_v32 }
 0x266   :  { %1670 = vmatprep.subr.bf16.mxu1 %v1907_v3 }
 0x268   :  { %1661 = vmatmul.mubr.msk.bf16.vlgmr.msra.gmra.mrb[16].mxu1 %vm76_vm1, %v1988_v11 }
 0x269   :  { %v1828_v34 = vpop.eup %1827  ;;  %1672 = vmatprep.mubr.msk.bf16.mxu1 %vm1908_vm0, %v1907_v3 }
 0x26a   :  { %v304_v35 = vsel %vm291_vm4, %v1828_v34, 0.0 }
 0x26b   :  { %305 = vadd.xlane.f32.xlu1 %v304_v35  ;;  %v567_v35 = vstv %s1793_s15 }
 0x26d   :  { %v1830_v36 = vpop.eup %1829 }
 0x26e   :  { %v307_v37 = vsel %vm291_vm4, %v1830_v36, 0.0 }
 0x26f   :  { %308 = vadd.xlane.f32.xlu1 %v307_v37 }
 0x2f8   :  { %v306_v54 = vpop.xlane.xlu1 %305 }
 0x2f9   :  { %1831 = vrcp.f32 %v306_v54 }
 0x2fc   :  { %v309_v55 = vpop.xlane.xlu1 %308 }
 0x2fd   :  { %1833 = vrcp.f32 %v309_v55 }
 0x303   :  { %v1832_v56 = vpop.eup %1831 }
 0x304   :  { %v311_v60 = vmul.f32 %v1832_v56, %v1828_v34  ;;  %v563_v34 = vsub.f32 %v2059_v50, %v561_v33 }
 0x306   :  { %v569_v37 = vmul.f32 %v567_v35, %v563_v34 }
 0x307   :  { %v1834_v59 = vpop.eup %1833 }
 0x308   :  { %v313_v61 = vmul.f32 %v1834_v59, %v1830_v36  ;;  %v564_v36 = vsub.f32 %v2061_v52, %v561_v33  ;;  %v571_v39 = vand.u32 2147483647, %v569_v37 }
 0x30a   :  { %v314_v63 = vpack.c.bf16 %v313_v61, %v311_v60  ;;  %v570_v38 = vmul.f32 %v567_v35, %v564_v36  ;;  %v573_v41 = vadd.f32 1e-05, %v571_v39  ;;  %v1506_v35 = vld [vmem:[%s2371_s1 + $0x40] sm:$0xff]  ;;  %v1507_v36 = vld [vmem:[%s2371_s1 + $0x48] sm:$0xff] }
 0x30c   :  { %1637 = vmatmul.mubr.msk.bf16.vlgmr.msra.gmra.mrb[4].mxu0 %vm291_vm4, %v314_v63  ;;  %v572_v40 = vand.u32 2147483647, %v570_v38  ;;  %1835 = vlog2.f32 %v573_v41 }
 0x30d   :  { %1649 = vmatpush3.bf16.msra.mxu0 %v373_v62  ;;  %1652 = vmatprep.mubr.msk.bf16.mxu0 %vm1908_vm0, %v1907_v3 }
 0x30e   :  { %1650 = vmatprep.subr.bf16.mxu0 %v1907_v3  ;;  %v574_v42 = vadd.f32 1e-05, %v572_v40  ;;  %v764_v40 = vpack.c.bf16 %v1507_v36, %v1506_v35  ;;  %v1515_v35 = vld [vmem:[%s2373_s3 + $0x48] sm:$0xff]  ;;  %v1516_v36 = vld [vmem:[%s2373_s3 + $0x50] sm:$0xff] }
 0x310   :  { %1837 = vlog2.f32 %v574_v42  ;;  %v1508_v42 = vld [vmem:[%s2371_s1 + $0x50] sm:$0xff] }
 0x311   :  { %1651 = vmatpush3.bf16.msra.mxu0 %v374_v2 }
 0x312   :  { %1664 = vmatprep.subr.bf16.mxu0 %v1907_v3 }
 0x314   :  { %1653 = vmatmul.mubr.msk.bf16.vlgmr.msra.gmra.mrb[8].mxu0 %vm76_vm1, %v1988_v11 }
 0x315   :  { %1666 = vmatprep.mubr.msk.bf16.mxu0 %vm1908_vm0, %v1907_v3 }
 0x316   :  { %v1836_v43 = vpop.eup %1835 }
 0x317   :  { %v576_v48 = vmul.f32 0.6931472, %v1836_v43  ;;  %v1509_v43 = vld [vmem:[%s2371_s1 + $0x58] sm:$0xff] }
 0x319   :  { %v583_v53 = vmul.f32 %v581_v49, %v576_v48  ;;  %v1510_v48 = vld [vmem:[%s2372_s2 + $0x40] sm:$0xff] }
 0x31a   :  { %v1838_v44 = vpop.eup %1837 }
 0x31b   :  { %v578_v51 = vmul.f32 0.6931472, %v1838_v44  ;;  %v585_v55 = vmul.f32 1.442695, %v583_v53  ;;  %v765_v44 = vpack.c.bf16 %v1509_v43, %v1508_v42  ;;  %v1512_v53 = vld [vmem:[%s2372_s2 + $0x50] sm:$0xff] }
 0x31d   :  { %v584_v54 = vmul.f32 %v581_v49, %v578_v51  ;;  %1839 = vpow2.f32 %v585_v55  ;;  %v1511_v49 = vld [vmem:[%s2372_s2 + $0x48] sm:$0xff] }
 0x31e   :  { %v771_v51 = vpack.c.bf16 %v1511_v49, %v1510_v48 }
 0x31f   :  { %v587_v56 = vmul.f32 1.442695, %v584_v54  ;;  %v1513_v54 = vld [vmem:[%s2372_s2 + $0x58] sm:$0xff] }
 0x320   :  { %v772_v55 = vpack.c.bf16 %v1513_v54, %v1512_v53 }
 0x321   :  { %1841 = vpow2.f32 %v587_v56  ;;  %v1498_v56 = vld [vmem:[%s2374_s4 + $0x8] sm:$0xff] }
 0x327   :  { %v1840_v57 = vpop.eup %1839 }
 0x328   :  { %v589_v59 = vsub.f32 0.0, %v1840_v57  ;;  %v384_v57 = vpack.c.bf16 %v1498_v56, %v1498_v56 }
 0x32b   :  { %v1842_v58 = vpop.eup %1841 }
 0x32c   :  { %v590_v63 = vsub.f32 0.0, %v1842_v58  ;;  %v669_v58 = vsel %vm667_vm6, %v384_v57, 0 }
 0x33b   :  { %v501_v27 = vpop.f32.mrb[16].mxu1 }
 0x33c   :  { %v1662_v28 = vpop.f32.mrb[17].mxu1 }
 0x33d   :  { %v504_v29 = vpop.f32.mrb[18].mxu1  ;;  %v1529_v28 = vld [vmem:[%s2372_s2 + $0x60] sm:$0xff] }
 0x33e   :  { %v1663_v30 = vpop.f32.mrb[19].mxu1  ;;  %v618_v31 = vpack.c.bf16 %v504_v29, %v501_v27  ;;  %v1530_v29 = vld [vmem:[%s2372_s2 + $0x68] sm:$0xff] }
 0x33f   :  { %v1123_v30 = vpack.c.bf16 %v1530_v29, %v1529_v28 }
 0x340   :  { %1671 = vmatpush3.bf16.msra.mxu1 %v618_v31  ;;  %v1531_v31 = vld [vmem:[%s2372_s2 + $0x70] sm:$0xff] }
 0x341   :  { %1688 = vmatprep.subr.bf16.mxu1 %v1907_v3 }
 0x3df   :  { %v2122_v13 = vpop.f32.mrb[4].mxu0 }
 0x3e0   :  { %v1638_v14 = vpop.f32.mrb[5].mxu0 }
 0x3e1   :  { %v2124_v15 = vpop.f32.mrb[6].mxu0 }
 0x3e2   :  { %v360_v16 = vpack.c.bf16 %v2124_v15, %v2122_v13  ;;  %v1639_v17 = vpop.f32.mrb[7].mxu0  ;;  %v1526_v13 = vld [vmem:[%s2371_s1 + $0x68] sm:$0xff] }
 0x3e7   :  { %v460_v18 = vpop.f32.mrb[8].mxu0 }
 0x3e8   :  { %v1654_v19 = vpop.f32.mrb[9].mxu0 }
 0x3e9   :  { %v463_v20 = vpop.f32.mrb[10].mxu0 }
 0x3ea   :  { %v509_v21 = vpack.c.bf16 %v463_v20, %v460_v18  ;;  %v1655_v22 = vpop.f32.mrb[11].mxu0 }
 0x3ec   :  { %v514_v23 = vsel %vm205_vm2, %v509_v21, 0 }
 0x3ed   :  { %1665 = vmatpush3.bf16.xpose.msra.mxu0 %v514_v23 }
 0x3ee   :  { %1676 = vmatprep.subr.bf16.mxu0 %v1907_v3 }
 0x3f4   :  { %1667 = vmatmul.mubr.msk.bf16.vlgmr.msra.gmra.mrb[12].mxu0 %vm205_vm2, %v508_v7 }
 0x3f5   :  { %1678 = vmatprep.mubr.msk.bf16.mxu0 %vm1908_vm0, %v1907_v3  ;;  %1677 = vmatpush3.bf16.msra.mxu0 %v669_v58 }
 0x3f6   :  { %1682 = vmatprep.subr.bf16.mxu0 %v1907_v3 }
 0x4c7   :  { %v550_v60 = vpop.f32.mrb[12].mxu0 }
 0x4c8   :  { %v557_v61 = vmul.f32 0.35355338, %v550_v60  ;;  %v1668_v62 = vpop.f32.mrb[13].mxu0  ;;  %v963_v60 = vrot.slane %v2013_v24, 2 }
 0x4c9   :  { %v553_v0 = vpop.f32.mrb[14].mxu0  ;;  %v74_v62 = vld [vmem:[%s2374_s4] sm:$0xff] }
 0x4ca   :  { %v591_v1 = vadd.f32 %v589_v59, %v557_v61  ;;  %v558_v2 = vmul.f32 0.35355338, %v553_v0  ;;  %v1669_v4 = vpop.f32.mrb[15].mxu0  ;;  %v957_v59 = vrot.slane %v2015_v25, 2  ;;  %v977_v61 = vrot.slane %v2020_v26, 2 }
 0x4cc   :  { %v592_v5 = vadd.f32 %v590_v63, %v558_v2  ;;  %v593_v6 = vsel %vm43_vm3, -1e+30, %v591_v1  ;;  %1796 = vpush %v957_v59  ;;  %v75_v63 = vpack.c.bf16 %v74_v62, %v74_v62 }
 0x4cd   :  { %v595_v7 = vsel %vm291_vm4, %v593_v6, -inf  ;;  %1798 = vpush %v963_v60 }
 0x4ce   :  { %596 = vmax.xlane.f32.xlu0 %v595_v7  ;;  %v594_v8 = vsel %vm44_vm5, -1e+30, %v592_v5  ;;  %1800 = vpush %v977_v61 }
 0x4cf   :  { %v598_v9 = vsel %vm291_vm4, %v594_v8, -inf }
 0x4d0   :  { %599 = vmax.xlane.f32.xlu1 %v598_v9 }
 0x4fd   :  { %s1797_s7 = spop %1796 }
 0x4fe   :  { %s1799_s30 = spop %1798 }
 0x4ff   :  { %v965_v42 = vstv %s1799_s30  ;;  %s1801_s9 = spop %1800 }
 0x500   :  { %v979_v58 = vstv %s1801_s9 }
 0x55b   :  { %v597_v10 = vpop.xlane.xlu0 %596 }
 0x55c   :  { %v601_v12 = vsub.f32 %v593_v6, %v597_v10  ;;  %v716_v6 = vsel %vm667_vm6, %v75_v63, 0 }
 0x55d   :  { %v600_v14 = vpop.xlane.xlu1 %599 }
 0x55e   :  { %v603_v17 = vmul.f32 1.442695, %v601_v12  ;;  %v602_v18 = vsub.f32 %v594_v8, %v600_v14 }
 0x560   :  { %1843 = vpow2.f32 %v603_v17  ;;  %v605_v19 = vmul.f32 1.442695, %v602_v18 }
 0x562   :  { %1845 = vpow2.f32 %v605_v19 }
 0x56a   :  { %v1844_v20 = vpop.eup %1843 }
 0x56b   :  { %v607_v21 = vsel %vm291_vm4, %v1844_v20, 0.0 }
 0x56c   :  { %v1846_v22 = vpop.eup %1845  ;;  %608 = vadd.xlane.f32.xlu0 %v607_v21 }
 0x56d   :  { %v610_v23 = vsel %vm291_vm4, %v1846_v22, 0.0 }
 0x56e   :  { %611 = vadd.xlane.f32.xlu1 %v610_v23  ;;  %v1528_v23 = vld [vmem:[%s2371_s1 + $0x78] sm:$0xff] }
 0x5f9   :  { %v609_v32 = vpop.xlane.xlu0 %608 }
 0x5fa   :  { %1847 = vrcp.f32 %v609_v32  ;;  %v1532_v32 = vld [vmem:[%s2372_s2 + $0x78] sm:$0xff] }
 0x5fb   :  { %v612_v33 = vpop.xlane.xlu1 %611 }
 0x5fc   :  { %1849 = vrcp.f32 %v612_v33  ;;  %v1124_v33 = vpack.c.bf16 %v1532_v32, %v1531_v31  ;;  %v1309_v32 = vrot.slane %v2015_v25, 3 }
 0x5fe   :  { %1802 = vpush %v1309_v32 }
 0x604   :  { %v1848_v34 = vpop.eup %1847 }
 0x605   :  { %v614_v38 = vmul.f32 %v1848_v34, %v1844_v20  ;;  %v1514_v34 = vld [vmem:[%s2373_s3 + $0x40] sm:$0xff] }
 0x606   :  { %v1850_v37 = vpop.eup %1849 }
 0x607   :  { %v616_v39 = vmul.f32 %v1850_v37, %v1846_v22  ;;  %v1525_v22 = vld [vmem:[%s2371_s1 + $0x60] sm:$0xff]  ;;  %v778_v37 = vpack.c.bf16 %v1515_v35, %v1514_v34  ;;  %v1329_v34 = vrot.slane %v2020_v26, 3 }
 0x608   :  { %v1116_v15 = vpack.c.bf16 %v1526_v13, %v1525_v22 }
 0x609   :  { %v617_v41 = vpack.c.bf16 %v616_v39, %v614_v38  ;;  %v1517_v38 = vld [vmem:[%s2373_s3 + $0x58] sm:$0xff] }
 0x60a   :  { %v779_v39 = vpack.c.bf16 %v1517_v38, %v1516_v36 }
 0x60b   :  { %1673 = vmatmul.mubr.msk.bf16.vlgmr.msra.gmra.mrb[20].mxu1 %vm291_vm4, %v617_v41 }
 0x60c   :  { %1689 = vmatpush3.bf16.msra.mxu1 %v764_v40  ;;  %1692 = vmatprep.mubr.msk.bf16.mxu1 %vm1908_vm0, %v1907_v3  ;;  %v959_v40 = vstv %s1797_s7 }
 0x60d   :  { %1690 = vmatprep.subr.bf16.mxu1 %v1907_v3  ;;  %v961_v41 = vsub.f32 %v2059_v50, %v959_v40  ;;  %v962_v43 = vsub.f32 %v2061_v52, %v959_v40 }
 0x60f   :  { %v968_v48 = vmul.f32 %v965_v42, %v962_v43 }
 0x610   :  { %1691 = vmatpush3.bf16.msra.mxu1 %v765_v44  ;;  %v967_v44 = vmul.f32 %v965_v42, %v961_v41 }
 0x611   :  { %1696 = vmatprep.subr.bf16.mxu1 %v1907_v3 }
 0x612   :  { %v969_v49 = vand.u32 2147483647, %v967_v44 }
 0x613   :  { %1693 = vmatmul.mubr.msk.bf16.vlgmr.msra.gmra.mrb[24].mxu1 %vm76_vm1, %v1988_v11 }
 0x614   :  { %1697 = vmatpush3.bf16.msra.mxu1 %v771_v51  ;;  %1700 = vmatprep.mubr.msk.bf16.mxu1 %vm1908_vm0, %v1907_v3  ;;  %v970_v51 = vand.u32 2147483647, %v968_v48  ;;  %v971_v53 = vadd.f32 1e-05, %v969_v49 }
 0x615   :  { %1698 = vmatprep.subr.bf16.mxu1 %v1907_v3 }
 0x616   :  { %v972_v54 = vadd.f32 1e-05, %v970_v51  ;;  %1851 = vlog2.f32 %v971_v53 }
 0x618   :  { %1699 = vmatpush3.bf16.msra.mxu1 %v772_v55  ;;  %1853 = vlog2.f32 %v972_v54 }
 0x619   :  { %1712 = vmatprep.subr.bf16.mxu1 %v1907_v3 }
 0x61b   :  { %1701 = vmatmul.mubr.msk.bf16.vlgmr.msra.gmra.mrb[28].mxu1 %vm76_vm1, %v1988_v11 }
 0x61c   :  { %1714 = vmatprep.mubr.msk.bf16.mxu1 %vm1908_vm0, %v1907_v3 }
 0x620   :  { %v1852_v55 = vpop.eup %1851 }
 0x621   :  { %v974_v57 = vmul.f32 0.6931472, %v1852_v55 }
 0x622   :  { %v1854_v56 = vpop.eup %1853 }
 0x623   :  { %v976_v59 = vmul.f32 0.6931472, %v1854_v56  ;;  %v981_v60 = vmul.f32 %v979_v58, %v974_v57 }
 0x625   :  { %v982_v61 = vmul.f32 %v979_v58, %v976_v59  ;;  %v983_v62 = vmul.f32 1.442695, %v981_v60 }
 0x627   :  { %v985_v63 = vmul.f32 1.442695, %v982_v61  ;;  %1855 = vpow2.f32 %v983_v62 }
 0x629   :  { %1857 = vpow2.f32 %v985_v63 }
 0x62f   :  { %s1803_s10 = spop %1802 }
 0x630   :  { %v1311_v26 = vstv %s1803_s10 }
 0x631   :  { %v1313_v43 = vsub.f32 %v2059_v50, %v1311_v26  ;;  %v1314_v51 = vsub.f32 %v2061_v52, %v1311_v26 }
 0x6de   :  { %v656_v0 = vpop.f32.mrb[20].mxu1 }
 0x6df   :  { %v1674_v1 = vpop.f32.mrb[21].mxu1 }
 0x6e0   :  { %v659_v2 = vpop.f32.mrb[22].mxu1 }
 0x6e1   :  { %v663_v4 = vpack.c.bf16 %v659_v2, %v656_v0  ;;  %v1675_v5 = vpop.f32.mrb[23].mxu1  ;;  %v1856_v0 = vpop.eup %1855 }
 0x6e2   :  { %v1858_v1 = vpop.eup %1857  ;;  %v987_v2 = vsub.f32 0.0, %v1856_v0 }
 0x6e3   :  { %1679 = vmatmul.mubr.msk.bf16.vlgmr.msra.gmra.mrb[16].mxu0 %vm205_vm2, %v663_v4 }
 0x6e4   :  { %1683 = vmatpush3.bf16.msra.mxu0 %v716_v6  ;;  %1684 = vmatprep.mubr.msk.bf16.mxu0 %vm1908_vm0, %v1907_v3 }
 0x6e5   :  { %1704 = vmatprep.subr.bf16.mxu0 %v1907_v3 }
 0x6e6   :  { %v817_v7 = vpop.f32.mrb[24].mxu1 }
 0x6e7   :  { %v1694_v8 = vpop.f32.mrb[25].mxu1 }
 0x6e8   :  { %v820_v9 = vpop.f32.mrb[26].mxu1 }
 0x6e9   :  { %v906_v10 = vpack.c.bf16 %v820_v9, %v817_v7  ;;  %v1695_v12 = vpop.f32.mrb[27].mxu1  ;;  %v988_v7 = vsub.f32 0.0, %v1858_v1 }
 0x6ee   :  { %v858_v14 = vpop.f32.mrb[28].mxu1 }
 0x6ef   :  { %1685 = vmatmul.mubr.msk.bf16.vlgmr.msra.gmra.mrb[16].mxu0 %vm205_vm2, %v360_v16  ;;  %v1702_v17 = vpop.f32.mrb[29].mxu1  ;;  %v1527_v16 = vld [vmem:[%s2371_s1 + $0x70] sm:$0xff] }
 0x6f0   :  { %v861_v18 = vpop.f32.mrb[30].mxu1  ;;  %1708 = vmatprep.mubr.msk.bf16.mxu0 %vm1908_vm0, %v1907_v3  ;;  %v1117_v27 = vpack.c.bf16 %v1528_v23, %v1527_v16  ;;  %1705 = vmatpush3.bf16.msra.mxu0 %v778_v37 }
 0x6f1   :  { %v907_v19 = vpack.c.bf16 %v861_v18, %v858_v14  ;;  %v1703_v20 = vpop.f32.mrb[31].mxu1  ;;  %1706 = vmatprep.subr.bf16.mxu0 %v1907_v3 }
 0x6f3   :  { %v912_v21 = vsel %vm205_vm2, %v907_v19, 0 }
 0x6f4   :  { %1713 = vmatpush3.bf16.xpose.msra.mxu1 %v912_v21  ;;  %1707 = vmatpush3.bf16.msra.mxu0 %v779_v39 }
 0x6f5   :  { %1730 = vmatprep.subr.bf16.mxu1 %v1907_v3  ;;  %1718 = vmatprep.subr.bf16.mxu0 %v1907_v3 }
 0x6f7   :  { %1709 = vmatmul.mubr.msk.bf16.vlgmr.msra.gmra.mrb[20].mxu0 %vm76_vm1, %v1988_v11 }
 0x6f8   :  { %1720 = vmatprep.mubr.msk.bf16.mxu0 %vm1908_vm0, %v1907_v3 }
 0x6fb   :  { %1715 = vmatmul.mubr.msk.bf16.vlgmr.msra.gmra.mrb[32].mxu1 %vm205_vm2, %v906_v10 }
 0x6fc   :  { %1731 = vmatpush3.bf16.msra.mxu1 %v1116_v15  ;;  %1734 = vmatprep.mubr.msk.bf16.mxu1 %vm1908_vm0, %v1907_v3 }
 0x6fd   :  { %1732 = vmatprep.subr.bf16.mxu1 %v1907_v3 }
 0x700   :  { %1733 = vmatpush3.bf16.msra.mxu1 %v1117_v27 }
 0x701   :  { %1738 = vmatprep.subr.bf16.mxu1 %v1907_v3 }
 0x703   :  { %1735 = vmatmul.mubr.msk.bf16.vlgmr.msra.gmra.mrb[36].mxu1 %vm76_vm1, %v1988_v11 }
 0x704   :  { %1739 = vmatpush3.bf16.msra.mxu1 %v1123_v30  ;;  %1742 = vmatprep.mubr.msk.bf16.mxu1 %vm1908_vm0, %v1907_v3 }
 0x705   :  { %1740 = vmatprep.subr.bf16.mxu1 %v1907_v3 }
 0x708   :  { %1741 = vmatpush3.bf16.msra.mxu1 %v1124_v33  ;;  %v1315_v33 = vrot.slane %v2013_v24, 3 }
 0x709   :  { %1754 = vmatprep.subr.bf16.mxu1 %v1907_v3 }
 0x70a   :  { %1804 = vpush %v1315_v33 }
 0x70b   :  { %1743 = vmatmul.mubr.msk.bf16.vlgmr.msra.gmra.mrb[40].mxu1 %vm76_vm1, %v1988_v11  ;;  %1806 = vpush %v1329_v34 }
 0x70c   :  { %1756 = vmatprep.mubr.msk.bf16.mxu1 %vm1908_vm0, %v1907_v3 }
 0x73b   :  { %s1805_s11 = spop %1804 }
 0x73c   :  { %v1317_v48 = vstv %s1805_s11  ;;  %s1807_s12 = spop %1806 }
 0x73d   :  { %v1319_v55 = vmul.f32 %v1317_v48, %v1313_v43  ;;  %v1320_v57 = vmul.f32 %v1317_v48, %v1314_v51  ;;  %v1331_v0 = vstv %s1807_s12 }
 0x73f   :  { %v1321_v58 = vand.u32 2147483647, %v1319_v55  ;;  %v1322_v59 = vand.u32 2147483647, %v1320_v57 }
 0x741   :  { %v1323_v60 = vadd.f32 1e-05, %v1321_v58  ;;  %v1324_v61 = vadd.f32 1e-05, %v1322_v59 }
 0x7ca   :  { %v899_v44 = vpop.f32.mrb[20].mxu0 }
 0x7cb   :  { %v1710_v49 = vpop.f32.mrb[21].mxu0 }
 0x7cc   :  { %v902_v53 = vpop.f32.mrb[22].mxu0 }
 0x7cd   :  { %v1711_v54 = vpop.f32.mrb[23].mxu0  ;;  %v1016_v56 = vpack.c.bf16 %v902_v53, %v899_v44  ;;  %v1535_v53 = vld [vmem:[%s2373_s3 + $0x70] sm:$0xff] }
 0x7ce   :  { %v948_v4 = vpop.f32.mrb[32].mxu1  ;;  %v1536_v54 = vld [vmem:[%s2373_s3 + $0x78] sm:$0xff] }
 0x7cf   :  { %v955_v5 = vmul.f32 0.35355338, %v948_v4  ;;  %v1716_v6 = vpop.f32.mrb[33].mxu1  ;;  %1719 = vmatpush3.bf16.msra.mxu0 %v1016_v56  ;;  %v1131_v55 = vpack.c.bf16 %v1536_v54, %v1535_v53 }
 0x7d0   :  { %v951_v8 = vpop.f32.mrb[34].mxu1  ;;  %1724 = vmatprep.subr.bf16.mxu0 %v1907_v3 }
 0x7d1   :  { %v989_v9 = vadd.f32 %v987_v2, %v955_v5  ;;  %v956_v10 = vmul.f32 0.35355338, %v951_v8  ;;  %v1717_v12 = vpop.f32.mrb[35].mxu1 }
 0x7d3   :  { %v990_v14 = vadd.f32 %v988_v7, %v956_v10  ;;  %v991_v17 = vsel %vm43_vm3, -1e+30, %v989_v9 }
 0x7d4   :  { %v993_v18 = vsel %vm291_vm4, %v991_v17, -inf }
 0x7d5   :  { %994 = vmax.xlane.f32.xlu0 %v993_v18  ;;  %v992_v19 = vsel %vm44_vm5, -1e+30, %v990_v14 }
 0x7d6   :  { %v996_v20 = vsel %vm291_vm4, %v992_v19, -inf  ;;  %v1169_v21 = vpop.f32.mrb[36].mxu1 }
 0x7d7   :  { %997 = vmax.xlane.f32.xlu1 %v996_v20  ;;  %v1736_v22 = vpop.f32.mrb[37].mxu1 }
 0x7d8   :  { %v1172_v13 = vpop.f32.mrb[38].mxu1 }
 0x7d9   :  { %v1258_v15 = vpack.c.bf16 %v1172_v13, %v1169_v21  ;;  %v1737_v16 = vpop.f32.mrb[39].mxu1 }
 0x7de   :  { %v1210_v23 = vpop.f32.mrb[40].mxu1 }
 0x7df   :  { %v1744_v27 = vpop.f32.mrb[41].mxu1 }
 0x7e0   :  { %v1213_v28 = vpop.f32.mrb[42].mxu1 }
 0x7e1   :  { %v1259_v29 = vpack.c.bf16 %v1213_v28, %v1210_v23  ;;  %v1745_v30 = vpop.f32.mrb[43].mxu1 }
 0x7e3   :  { %v1264_v31 = vsel %vm205_vm2, %v1259_v29, 0 }
 0x7e4   :  { %1755 = vmatpush3.bf16.xpose.msra.mxu1 %v1264_v31 }
 0x7eb   :  { %1757 = vmatmul.mubr.msk.bf16.vlgmr.msra.gmra.mrb[44].mxu1 %vm205_vm2, %v1258_v15 }
 0x862   :  { %v995_v35 = vpop.xlane.xlu0 %994 }
 0x863   :  { %v999_v36 = vsub.f32 %v991_v17, %v995_v35 }
 0x864   :  { %v998_v37 = vpop.xlane.xlu1 %997 }
 0x865   :  { %v1001_v38 = vmul.f32 1.442695, %v999_v36  ;;  %v1000_v39 = vsub.f32 %v992_v19, %v998_v37 }
 0x867   :  { %1859 = vpow2.f32 %v1001_v38  ;;  %v1003_v40 = vmul.f32 1.442695, %v1000_v39  ;;  %v1518_v39 = vld [vmem:[%s2374_s4 + $0x10] sm:$0xff] }
 0x869   :  { %1861 = vpow2.f32 %v1003_v40 }
 0x86a   :  { %1863 = vlog2.f32 %v1323_v60 }
 0x86b   :  { %1865 = vlog2.f32 %v1324_v61 }
 0x871   :  { %v2299_v41 = vpop.eup %1859 }
 0x872   :  { %v1005_v25 = vsel %vm291_vm4, %v2299_v41, 0.0 }
 0x873   :  { %v1862_v24 = vpop.eup %1861  ;;  %1006 = vadd.xlane.f32.xlu0 %v1005_v25 }
 0x874   :  { %v1008_v42 = vsel %vm291_vm4, %v1862_v24, 0.0  ;;  %v1864_v50 = vpop.eup %1863 }
 0x875   :  { %1009 = vadd.xlane.f32.xlu1 %v1008_v42  ;;  %v1866_v62 = vpop.eup %1865  ;;  %v1326_v63 = vmul.f32 0.6931472, %v1864_v50  ;;  %v1534_v42 = vld [vmem:[%s2373_s3 + $0x68] sm:$0xff] }
 0x876   :  { %v1328_v52 = vmul.f32 0.6931472, %v1866_v62 }
 0x877   :  { %v1333_v1 = vmul.f32 %v1331_v0, %v1326_v63 }
 0x878   :  { %v1334_v2 = vmul.f32 %v1331_v0, %v1328_v52 }
 0x879   :  { %v1335_v4 = vmul.f32 1.442695, %v1333_v1 }
 0x87a   :  { %v1337_v5 = vmul.f32 1.442695, %v1334_v2 }
 0x87b   :  { %1867 = vpow2.f32 %v1335_v4 }
 0x87c   :  { %1869 = vpow2.f32 %v1337_v5 }
 0x885   :  { %v1868_v6 = vpop.eup %1867 }
 0x886   :  { %v1870_v7 = vpop.eup %1869  ;;  %v1339_v8 = vsub.f32 0.0, %v1868_v6 }
 0x887   :  { %v1340_v14 = vsub.f32 0.0, %v1870_v7 }
 0x8be   :  { %v1300_v9 = vpop.f32.mrb[44].mxu1 }
 0x8bf   :  { %v1307_v10 = vmul.f32 0.35355338, %v1300_v9  ;;  %v1758_v12 = vpop.f32.mrb[45].mxu1 }
 0x8c0   :  { %v1303_v17 = vpop.f32.mrb[46].mxu1 }
 0x8c1   :  { %v1341_v18 = vadd.f32 %v1339_v8, %v1307_v10  ;;  %v1308_v19 = vmul.f32 0.35355338, %v1303_v17  ;;  %v1759_v20 = vpop.f32.mrb[47].mxu1 }
 0x8c3   :  { %v1342_v21 = vadd.f32 %v1340_v14, %v1308_v19  ;;  %v1343_v22 = vsel %vm43_vm3, -1e+30, %v1341_v18 }
 0x8c4   :  { %v1345_v13 = vsel %vm291_vm4, %v1343_v22, -inf }
 0x8c5   :  { %1346 = vmax.xlane.f32.xlu0 %v1345_v13  ;;  %v1344_v15 = vsel %vm44_vm5, -1e+30, %v1342_v21 }
 0x8c6   :  { %v1348_v16 = vsel %vm291_vm4, %v1344_v15, -inf }
 0x8c7   :  { %1349 = vmax.xlane.f32.xlu1 %v1348_v16 }
 0x900   :  { %v1007_v23 = vpop.xlane.xlu0 %1006 }
 0x901   :  { %1871 = vrcp.f32 %v1007_v23 }
 0x902   :  { %v1010_v27 = vpop.xlane.xlu1 %1009 }
 0x903   :  { %1873 = vrcp.f32 %v1010_v27 }
 0x90b   :  { %v1872_v28 = vpop.eup %1871 }
 0x90c   :  { %v1012_v30 = vmul.f32 %v1872_v28, %v2299_v41  ;;  %v782_v41 = vpack.c.bf16 %v1518_v39, %v1518_v39 }
 0x90d   :  { %v1874_v29 = vpop.eup %1873 }
 0x90e   :  { %v1014_v45 = vmul.f32 %v1874_v29, %v1862_v24  ;;  %v1066_v25 = vsel %vm667_vm6, %v782_v41, 0  ;;  %v1533_v24 = vld [vmem:[%s2373_s3 + $0x60] sm:$0xff] }
 0x90f   :  { %v1130_v48 = vpack.c.bf16 %v1534_v42, %v1533_v24 }
 0x910   :  { %v1015_v31 = vpack.c.bf16 %v1014_v45, %v1012_v30 }
 0x912   :  { %1721 = vmatmul.mubr.msk.bf16.vlgmr.msra.gmra.mrb[24].mxu0 %vm291_vm4, %v1015_v31 }
 0x913   :  { %1726 = vmatprep.mubr.msk.bf16.mxu0 %vm1908_vm0, %v1907_v3  ;;  %1725 = vmatpush3.bf16.msra.mxu0 %v1066_v25 }
 0x914   :  { %1746 = vmatprep.subr.bf16.mxu0 %v1907_v3 }
 0x952   :  { %v1347_v46 = vpop.xlane.xlu0 %1346 }
 0x953   :  { %v1351_v47 = vsub.f32 %v1343_v22, %v1347_v46 }
 0x954   :  { %v1350_v32 = vpop.xlane.xlu1 %1349 }
 0x955   :  { %v1353_v33 = vmul.f32 1.442695, %v1351_v47  ;;  %v1352_v34 = vsub.f32 %v1344_v15, %v1350_v32 }
 0x957   :  { %1875 = vpow2.f32 %v1353_v33  ;;  %v1355_v35 = vmul.f32 1.442695, %v1352_v34 }
 0x959   :  { %1877 = vpow2.f32 %v1355_v35 }
 0x961   :  { %v1876_v36 = vpop.eup %1875 }
 0x962   :  { %v1357_v37 = vsel %vm291_vm4, %v1876_v36, 0.0 }
 0x963   :  { %v1878_v38 = vpop.eup %1877  ;;  %1358 = vadd.xlane.f32.xlu0 %v1357_v37 }
 0x964   :  { %v1360_v40 = vsel %vm291_vm4, %v1878_v38, 0.0 }
 0x965   :  { %1361 = vadd.xlane.f32.xlu1 %v1360_v40 }
 0x9e5   :  { %v1054_v26 = vpop.f32.mrb[24].mxu0 }
 0x9e6   :  { %v1722_v43 = vpop.f32.mrb[25].mxu0 }
 0x9e7   :  { %v1057_v44 = vpop.f32.mrb[26].mxu0 }
 0x9e8   :  { %v1061_v49 = vpack.c.bf16 %v1057_v44, %v1054_v26  ;;  %v1723_v51 = vpop.f32.mrb[27].mxu0 }
 0x9ea   :  { %1727 = vmatmul.mubr.msk.bf16.vlgmr.msra.gmra.mrb[16].mxu0 %vm205_vm2, %v1061_v49 }
 0x9eb   :  { %1747 = vmatpush3.bf16.msra.mxu0 %v1130_v48  ;;  %1750 = vmatprep.mubr.msk.bf16.mxu0 %vm1908_vm0, %v1907_v3 }
 0x9ec   :  { %1748 = vmatprep.subr.bf16.mxu0 %v1907_v3 }
 0x9ef   :  { %1749 = vmatpush3.bf16.msra.mxu0 %v1131_v55 }
 0x9f0   :  { %1760 = vmatprep.subr.bf16.mxu0 %v1907_v3  ;;  %v1359_v57 = vpop.xlane.xlu0 %1358 }
 0x9f2   :  { %1751 = vmatmul.mubr.msk.bf16.vlgmr.msra.gmra.mrb[28].mxu0 %vm76_vm1, %v1988_v11  ;;  %v1362_v56 = vpop.xlane.xlu1 %1361  ;;  %v1537_v11 = vld [vmem:[%s2374_s4 + $0x18] sm:$0xff]  ;;  %s1883_s4 = scalar_lea.vmem %s1471_s23, 256 }
 0x9f3   :  { %1762 = vmatprep.mubr.msk.bf16.mxu0 %vm1908_vm0, %v1907_v3  ;;  %1879 = vrcp.f32 %v1362_v56  ;;  %v1134_v2 = vpack.c.bf16 %v1537_v11, %v1537_v11  ;;  %p1884_p0 = scmp.ne.s32.totalorder %s1471_s23, %s1883_s4  ;;  %p1889_p2 = scmp.lt.s32.totalorder %s1883_s4, %s1883_s4 }
 0x9f4   :  { %1881 = vrcp.f32 %v1359_v57 }
 0x9f5   :  { %v1418_v4 = vsel %vm667_vm6, %v1134_v2, 0  ;;  %p1890_p3 = por %p1889_p2, %p1888_p1 }
 0x9f7   :  { %p1891_p4 = pnand %p1890_p3, %p1884_p0 }
 0x9fd   :  { %v1880_v58 = vpop.eup %1879 }
 0x9fe   :  { %v1882_v60 = vpop.eup %1881  ;;  %v1366_v50 = vmul.f32 %v1880_v58, %v1878_v38 }
 0x9ff   :  { %v1364_v52 = vmul.f32 %v1882_v60, %v1876_v36 }
 0xa01   :  { %v1367_v1 = vpack.c.bf16 %v1366_v50, %v1364_v52 }
 0xac5   :  { %v1251_v59 = vpop.f32.mrb[28].mxu0 }
 0xac6   :  { %v1752_v61 = vpop.f32.mrb[29].mxu0 }
 0xac7   :  { %v1254_v62 = vpop.f32.mrb[30].mxu0 }
 0xac8   :  { %v1368_v63 = vpack.c.bf16 %v1254_v62, %v1251_v59  ;;  %v1753_v0 = vpop.f32.mrb[31].mxu0 }
 0xaca   :  { %1761 = vmatpush3.bf16.msra.mxu0 %v1368_v63 }
 0xacb   :  { %1766 = vmatprep.subr.bf16.mxu0 %v1907_v3 }
 0xacd   :  { %1763 = vmatmul.mubr.msk.bf16.vlgmr.msra.gmra.mrb[32].mxu0 %vm291_vm4, %v1367_v1 }
 0xace   :  { %1768 = vmatprep.mubr.msk.bf16.mxu0 %vm1908_vm0, %v1907_v3  ;;  %1767 = vmatpush3.bf16.msra.mxu0 %v1418_v4 }
 0xba0   :  { %v1406_v5 = vpop.f32.mrb[32].mxu0 }
 0xba1   :  { %v1764_v6 = vpop.f32.mrb[33].mxu0 }
 0xba2   :  { %v1409_v7 = vpop.f32.mrb[34].mxu0 }
 0xba3   :  { %v1413_v8 = vpack.c.bf16 %v1409_v7, %v1406_v5  ;;  %v1765_v9 = vpop.f32.mrb[35].mxu0 }
 0xba5   :  { %1769 = vmatmul.mubr.msk.bf16.vlgmr.msra.gmra.mrb[16].mxu0 %vm205_vm2, %v1413_v8 }
 0xc78   :  { %v1454_v10 = vpop.f32.mrb[16].mxu0 }
 0xc79   :  { %1463 = vst.msk [vmem:[#allocation2] sm:$0xff] %vm76_vm1, %v1454_v10  ;;  %v1770_v3 = vpop.f32.mrb[17].mxu0 }
 0xc7a   :  { %v1457_v12 = vpop.f32.mrb[18].mxu0 }
 0xc7b   :  { %1464 = vst.msk [vmem:[#allocation2 + $0x8] sm:$0xff] %vm76_vm1, %v1457_v12  ;;  %v1771_v14 = vpop.f32.mrb[19].mxu0 }
 0xc7c   :  { %1894 = shalt.err (!%p1891_p4)
}
 0xc7d   :  { %s1895_s25 = scalar_lea.hbm %s2378_s8, 256 }
 0xc7e   :  { %p1896_p5 = scmp.ne.s32.totalorder %s2378_s8, %s1895_s25  ;;  %p1899_p6 = scmp.lt.u32.totalorder %s1895_s25, %s2378_s8 }
 0xc80   :  { %p1901_p7 = pnand %p1899_p6, %p1896_p5 }
 0xc82   :  { %1904 = shalt.err (!%p1901_p7)
}
 0xc83   :  { %s1910_s5 = smov 128   ;;  %s1911_s6 = smov 8  }
 0xc84   :  { %1476 = dma.vmem_to_hbm [thread:$0]  %s1471_s23, 256, %s2378_s8, [#allocation3], %s1910_s5, %s1910_s5, %s1911_s6  }
 0xc85   :  { %1905 = dma.done.wait [#allocation3], 256  }
 0xc86   :  { %1906 = vsyncadd [#allocation3], 4294967040 }
 0xc87   :  { %1480 = vsyncpa [#allocation3], 1 }

</bundles_post_ra>
